<compile_context>
chip_gen: v7x
topology: tpu7x:2x2x1
jax: 0.10.0
libtpu: 0.0.40
codegen_flags: <defaults>
</compile_context>

<pallas_src>
import numpy as np
import jax
import jax.numpy as jnp
from jax.experimental import pallas as pl
from jax.experimental.pallas import tpu as pltpu


def _round_up(v, m):
    return ((v + m - 1) // m) * m


def _tree_lstm_kernel(kb_ref,                       # scalar prefetch (SMEM), used by index_maps
                      x_ref, seg_ref, segT_ref, ph_ref, pc_ref, fh_ref,
                      wx_ref, wh_ref, b4_ref,
                      c_out_ref, h_out_ref,
                      zx_sc, ht_acc, fc_acc):
    f32, bf16 = jnp.float32, jnp.bfloat16
    Hp = h_out_ref.shape[1]
    k = pl.program_id(1)
    nk = pl.num_programs(1)

    # Per node-tile init (k is the innermost, sequential child-block axis).
    @pl.when(k == 0)
    def _():
        ht_acc[...] = jnp.zeros_like(ht_acc)
        fc_acc[...] = jnp.zeros_like(fc_acc)
        # Fused x-side gate matmul for [i | o | u | f]: W_f is packed as the 4th
        # gate block, b_combined lives in b4 (b_f is folded into fh).
        zx_sc[...] = (jnp.dot(x_ref[...], wx_ref[...], preferred_element_type=f32)
                      + b4_ref[...])

    seg_b = seg_ref[...]                            # (TM, KT) bf16 one-hot membership
    ph_b = ph_ref[...]                              # (KT, Hp) bf16 children hidden states

    # h_tilde accumulation: segment-sum over this child block (MXU).
    ht_acc[...] += jnp.dot(seg_b, ph_b, preferred_element_type=f32)

    # Forget gates, restricted to this child block.
    f_inputs = zx_sc[:, 3 * Hp:4 * Hp]              # (TM, Hp) f32  == x @ W_f
    # Per-child copy of the parent's W_f x_j row via the pre-transposed seg block
    # (plain MXU matmul, no in-kernel transpose).
    f_ready = jnp.dot(segT_ref[...], f_inputs.astype(bf16),
                      preferred_element_type=f32)   # (KT, Hp)
    # fh = prev_h @ U_f + b_f, precomputed once in the wrapper (grid-invariant).
    # NOTE: children whose parent lives in another node tile get f_ready == 0
    # here (wrong sigmoid argument), but their seg column is 0 in this tile, so
    # they contribute nothing to fc_acc below -> per-tile result is exact.
    f_jks = jax.nn.sigmoid(f_ready + fh_ref[...])   # (KT, Hp) f32 (EUP)
    fc_mul = f_jks * pc_ref[...].astype(f32)        # (KT, Hp)
    fc_acc[...] += jnp.dot(seg_b, fc_mul.astype(bf16), preferred_element_type=f32)

    # Finalize: h_tilde-side gate matmul + element-wise LSTM math + store.
    @pl.when(k == nk - 1)
    def _():
        z_h = jnp.dot(ht_acc[...].astype(bf16), wh_ref[...],
                      preferred_element_type=f32)   # (TM, 3Hp)
        z = zx_sc[:, :3 * Hp] + z_h
        z_i = z[:, 0 * Hp:1 * Hp]
        z_o = z[:, 1 * Hp:2 * Hp]
        z_u = z[:, 2 * Hp:3 * Hp]                   # dropout == identity (eval mode)
        c_new = jax.nn.sigmoid(z_i) * jnp.tanh(z_u) + fc_acc[...]
        h_new = jax.nn.sigmoid(z_o) * jnp.tanh(c_new)
        c_out_ref[...] = c_new.astype(c_out_ref.dtype)
        h_out_ref[...] = h_new.astype(h_out_ref.dtype)


def child_sum_tree_lstm_cell(inputs_mat, prev_c_mat, prev_h_mat, lens,
                             W_combined, b_combined, W_f, U_f, b_f,
                             *, tile_m=256, k_tile=256):
    """Returns (c, h), each (N, hidden) bf16, matching the PyTorch forward (eval mode).

    `lens` is the static list of child counts per node; children of node j must be
    the contiguous rows [sum(lens[:j]), sum(lens[:j+1])) of prev_h_mat / prev_c_mat
    (exactly the layout the PyTorch module builds with torch.cat).
    """
    N, D = inputs_mat.shape
    K, H = prev_h_mat.shape
    lens = [int(v) for v in lens]
    assert len(lens) == N and sum(lens) == K

    LANE, SUB = 128, 8
    f32, bf16 = jnp.float32, jnp.bfloat16

    Dp = _round_up(D, LANE)
    Hp = _round_up(H, LANE)
    TM = tile_m if N > tile_m else _round_up(N, SUB)
    Np = _round_up(N, TM)
    n_tiles = Np // TM

    KT = k_tile
    n_data_blocks = max(1, -(-K // KT))
    pad_block = n_data_blocks                       # dedicated all-zero child block for padding
    Kp = (n_data_blocks + 1) * KT

    # ---- static child layout -> per-tile child-block table (host / numpy) ----
    starts = np.concatenate([[0], np.cumsum(np.asarray(lens, np.int64))])
    node_ids = np.repeat(np.arange(N), lens)

    blocks_per_tile = []
    for i in range(n_tiles):
        n0, n1 = i * TM, min((i + 1) * TM, N)
        cs, ce = int(starts[n0]), int(starts[n1])
        blocks_per_tile.append(list(range(cs // KT, (ce - 1) // KT + 1)) if ce > cs else [])
    n_k_steps = max(1, max(len(b) for b in blocks_per_tile))
    kb_np = np.full((n_tiles, n_k_steps), pad_block, np.int32)
    for i, blks in enumerate(blocks_per_tile):
        kb_np[i, :len(blks)] = blks
    kb_tbl = jnp.asarray(kb_np.reshape(-1))         # flat 1-D int32 SMEM scalar-prefetch table

    # ---- dense one-hot membership (and its transpose) padded to block grid ----
    seg_np = np.zeros((Np, Kp), np.float32)
    if K > 0:
        seg_np[node_ids, np.arange(K)] = 1.0
    seg_p = jnp.asarray(seg_np, bf16)               # 0/1 exact in bf16
    segT_p = jnp.asarray(np.ascontiguousarray(seg_np.T), bf16)

    def pad2(a, rows, cols, dtype):
        return jnp.pad(a, ((0, rows - a.shape[0]), (0, cols - a.shape[1]))).astype(dtype)

    x_p = pad2(inputs_mat, Np, Dp, bf16)
    ph_p = pad2(prev_h_mat, Kp, Hp, bf16)
    pc_p = pad2(prev_c_mat, Kp, Hp, bf16)

    # Grid-invariant forget-gate hidden term, hoisted out of the kernel (plain XLA matmul).
    fh = prev_h_mat.astype(f32) @ U_f.astype(f32) + b_f.astype(f32)
    fh_p = pad2(fh, Kp, Hp, f32)

    # Gate-aligned, zero-padded weights:
    #   Wx4: x-side weights for [i | o | u | f]   (W_f fused as the 4th gate block)
    #   Wh3: h_tilde-side weights for [i | o | u]
    #   b4 : b_combined for [i | o | u]; f block zero (b_f folded into fh)
    Wx4 = jnp.zeros((Dp, 4 * Hp), f32)
    Wh3 = jnp.zeros((Hp, 3 * Hp), f32)
    b4 = jnp.zeros((1, 4 * Hp), f32)
    for g in range(3):
        Wx4 = Wx4.at[:D, g * Hp:g * Hp + H].set(W_combined[:D, g * H:(g + 1) * H])
        Wh3 = Wh3.at[:H, g * Hp:g * Hp + H].set(W_combined[D:, g * H:(g + 1) * H])
        b4 = b4.at[:, g * Hp:g * Hp + H].set(b_combined[:, g * H:(g + 1) * H])
    Wx4 = Wx4.at[:D, 3 * Hp:3 * Hp + H].set(W_f).astype(bf16)
    Wh3 = Wh3.astype(bf16)

    NKS = n_k_steps

    def kb_at(i, k, kb):
        return kb[i * NKS + k]

    c_p, h_p = pl.pallas_call(
        _tree_lstm_kernel,
        out_shape=(jax.ShapeDtypeStruct((Np, Hp), bf16),
                   jax.ShapeDtypeStruct((Np, Hp), bf16)),
        grid_spec=pltpu.PrefetchScalarGridSpec(
            num_scalar_prefetch=1,
            grid=(n_tiles, n_k_steps),
            in_specs=[
                pl.BlockSpec((TM, Dp), lambda i, k, kb: (i, 0)),                # x
                pl.BlockSpec((TM, KT), lambda i, k, kb: (i, kb_at(i, k, kb))),  # seg
                pl.BlockSpec((KT, TM), lambda i, k, kb: (kb_at(i, k, kb), i)),  # seg^T
                pl.BlockSpec((KT, Hp), lambda i, k, kb: (kb_at(i, k, kb), 0)),  # prev_h
                pl.BlockSpec((KT, Hp), lambda i, k, kb: (kb_at(i, k, kb), 0)),  # prev_c
                pl.BlockSpec((KT, Hp), lambda i, k, kb: (kb_at(i, k, kb), 0)),  # fh
                pl.BlockSpec((Dp, 4 * Hp), lambda i, k, kb: (0, 0)),            # Wx4 (resident)
                pl.BlockSpec((Hp, 3 * Hp), lambda i, k, kb: (0, 0)),            # Wh3 (resident)
                pl.BlockSpec((1, 4 * Hp), lambda i, k, kb: (0, 0)),             # b4
            ],
            out_specs=[
                pl.BlockSpec((TM, Hp), lambda i, k, kb: (i, 0)),
                pl.BlockSpec((TM, Hp), lambda i, k, kb: (i, 0)),
            ],
            scratch_shapes=[
                pltpu.VMEM((TM, 4 * Hp), jnp.float32),   # x-side gate pre-activations
                pltpu.VMEM((TM, Hp), jnp.float32),       # h_tilde accumulator
                pltpu.VMEM((TM, Hp), jnp.float32),       # fc_term accumulator
            ],
        ),
        compiler_params=pltpu.CompilerParams(
            dimension_semantics=("parallel", "arbitrary"),
            vmem_limit_bytes=48 * 1024 * 1024,
        ),
    )(kb_tbl, x_p, seg_p, segT_p, ph_p, pc_p, fh_p, Wx4, Wh3, b4)

    return c_p[:N, :H], h_p[:N, :H]


def _reference(inputs_mat, prev_c_mat, prev_h_mat, seg,
               W_combined, b_combined, W_f, U_f, b_f):
    """Plain-JAX f32 reference mirroring the PyTorch module (eval mode)."""
    H = prev_h_mat.shape[1]
    h_tilde = seg @ prev_h_mat
    big = jnp.concatenate([inputs_mat, h_tilde], axis=1) @ W_combined + b_combined
    z_i, z_o, z_u = big[:, :H], big[:, H:2 * H], big[:, 2 * H:]
    f_inputs = inputs_mat @ W_f
    f_hiddens = prev_h_mat @ U_f
    f_ready = seg.T @ f_inputs
    f_jks = jax.nn.sigmoid(f_ready + f_hiddens + b_f)
    fc_term = seg @ (f_jks * prev_c_mat)
    c = jax.nn.sigmoid(z_i) * jnp.tanh(z_u) + fc_term
    h = jax.nn.sigmoid(z_o) * jnp.tanh(c)
    return c, h


def _xavier_uniform(key, shape):
    fan_in, fan_out = shape
    bound = jnp.sqrt(6.0 / (fan_in + fan_out))
    return jax.random.uniform(key, shape, jnp.float32, -bound, bound)


if __name__ == "__main__":
    input_size, hidden_size = 16, 32
    lens = [1, 2, 3, 2]                 # number of children per node
    N, K = len(lens), sum(lens)

    key = jax.random.PRNGKey(0)
    k_wc, k_wf, k_uf, k_x, k_h, k_c = jax.random.split(key, 6)

    # Deterministic parameter init (matches the PyTorch module's __init__ shapes).
    W_combined = _xavier_uniform(k_wc, (input_size + hidden_size, 3 * hidden_size))
    b_combined = jnp.zeros((1, 3 * hidden_size), jnp.float32)
    W_f = _xavier_uniform(k_wf, (input_size, hidden_size))
    U_f = _xavier_uniform(k_uf, (hidden_size, hidden_size))
    b_f = jnp.zeros((1, hidden_size), jnp.float32)

    # Inputs: one row per node; children states concatenated across nodes
    # (children of node j are contiguous rows, as built by the PyTorch module).
    inputs_mat = jax.random.normal(k_x, (N, input_size), jnp.float32)
    prev_h_mat = jax.random.normal(k_h, (K, hidden_size), jnp.float32)
    prev_c_mat = jax.random.normal(k_c, (K, hidden_size), jnp.float32)

    c, h = child_sum_tree_lstm_cell(inputs_mat, prev_c_mat, prev_h_mat, lens,
                                    W_combined, b_combined, W_f, U_f, b_f)
    jax.block_until_ready((c, h))

    # One-hot child -> node membership matrix, only for the plain-JAX reference.
    node_ids = jnp.repeat(jnp.arange(N), jnp.array(lens), total_repeat_length=K)
    seg = (jnp.arange(N)[:, None] == node_ids[None, :]).astype(jnp.float32)  # (N, K)
    c_ref, h_ref = _reference(inputs_mat, prev_c_mat, prev_h_mat, seg,
                              W_combined, b_combined, W_f, U_f, b_f)

    # bf16 matmul operands / bf16 outputs (f32 accumulation) -> loosened tolerance.
    assert jnp.allclose(c.astype(jnp.float32), c_ref, atol=5e-2, rtol=5e-2), "c mismatch"
    assert jnp.allclose(h.astype(jnp.float32), h_ref, atol=5e-2, rtol=5e-2), "h mismatch"

    print("KERNEL_OK")
</pallas_src>

<mosaic_0001>
module attributes {stable_mosaic.version = 11 : i64} {
  func.func @_tree_lstm_kernel(%arg0: i32, %arg1: i32, %arg2: memref<1xi32, #tpu.memory_space<smem>>, %arg3: memref<8x128xbf16, #tpu.memory_space<vmem>>, %arg4: memref<8x256xbf16, #tpu.memory_space<vmem>>, %arg5: memref<256x8xbf16, #tpu.memory_space<vmem>>, %arg6: memref<256x128xbf16, #tpu.memory_space<vmem>>, %arg7: memref<256x128xbf16, #tpu.memory_space<vmem>>, %arg8: memref<256x128xf32, #tpu.memory_space<vmem>>, %arg9: memref<128x512xbf16, #tpu.memory_space<vmem>>, %arg10: memref<128x384xbf16, #tpu.memory_space<vmem>>, %arg11: memref<1x512xf32, #tpu.memory_space<vmem>>, %arg12: memref<8x128xbf16, #tpu.memory_space<vmem>>, %arg13: memref<8x128xbf16, #tpu.memory_space<vmem>>, %arg14: memref<8x512xf32, #tpu.memory_space<vmem>>, %arg15: memref<8x128xf32, #tpu.memory_space<vmem>>, %arg16: memref<8x128xf32, #tpu.memory_space<vmem>>) attributes {dimension_semantics = [#tpu.dimension_semantics<parallel>, #tpu.dimension_semantics<arbitrary>], iteration_bounds = array<i64: 1, 1>, scalar_prefetch = 1 : i64, scratch_operands = 3 : i64, tpu.core_type = #tpu.core_type<tc>, window_params = [{transform_indices = @transform_0, window_bounds = array<i64: 8, 128>}, {transform_indices = @transform_1, window_bounds = array<i64: 8, 256>}, {transform_indices = @transform_2, window_bounds = array<i64: 256, 8>}, {transform_indices = @transform_3, window_bounds = array<i64: 256, 128>}, {transform_indices = @transform_4, window_bounds = array<i64: 256, 128>}, {transform_indices = @transform_5, window_bounds = array<i64: 256, 128>}, {pipeline_mode = #tpu.pipeline_mode<synchronous>, transform_indices = @transform_6, window_bounds = array<i64: 128, 512>}, {pipeline_mode = #tpu.pipeline_mode<synchronous>, transform_indices = @transform_7, window_bounds = array<i64: 128, 384>}, {pipeline_mode = #tpu.pipeline_mode<synchronous>, transform_indices = @transform_8, window_bounds = array<i64: 1, 512>}, {transform_indices = @transform_9, window_bounds = array<i64: 8, 128>}, {transform_indices = @transform_10, window_bounds = array<i64: 8, 128>}]} {
    %c0_i32 = arith.constant 0 : i32
    %0 = arith.cmpi eq, %arg1, %c0_i32 : i32
    %1 = arith.extui %0 : i1 to i32
    %c0_i32_0 = arith.constant 0 : i32
    %2 = arith.cmpi ne, %1, %c0_i32_0 : i32
    scf.if %2 {
      %cst_24 = arith.constant 0.000000e+00 : f32
      %31 = vector.broadcast %cst_24 : f32 to vector<8x128xf32>
      %c0_25 = arith.constant 0 : index
      %c0_26 = arith.constant 0 : index
      %32 = vector.load %arg15[%c0_25, %c0_26] : memref<8x128xf32, #tpu.memory_space<vmem>>, vector<8x128xf32>
      tpu.vector_store %arg15[%c0_25, %c0_26], %31 {strides = array<i32>} : memref<8x128xf32, #tpu.memory_space<vmem>>, vector<8x128xf32>,
      %cst_27 = arith.constant 0.000000e+00 : f32
      %33 = vector.broadcast %cst_27 : f32 to vector<8x128xf32>
      %c0_28 = arith.constant 0 : index
      %c0_29 = arith.constant 0 : index
      %34 = vector.load %arg16[%c0_28, %c0_29] : memref<8x128xf32, #tpu.memory_space<vmem>>, vector<8x128xf32>
      tpu.vector_store %arg16[%c0_28, %c0_29], %33 {strides = array<i32>} : memref<8x128xf32, #tpu.memory_space<vmem>>, vector<8x128xf32>,
      %c0_30 = arith.constant 0 : index
      %c0_31 = arith.constant 0 : index
      %35 = vector.load %arg3[%c0_30, %c0_31] : memref<8x128xbf16, #tpu.memory_space<vmem>>, vector<8x128xbf16>
      %c0_32 = arith.constant 0 : index
      %c0_33 = arith.constant 0 : index
      %36 = vector.load %arg9[%c0_32, %c0_33] : memref<128x512xbf16, #tpu.memory_space<vmem>>, vector<128x512xbf16>
      %cst_34 = arith.constant dense<0.000000e+00> : vector<8x512xf32>
      %37 = tpu.matmul %35, %36, %cst_34 {dimension_numbers = #tpu.dot_dimension_numbers<[1], [0], [0], [1], [0, 0, 1, 1], [], []>} : vector<8x128xbf16>, vector<128x512xbf16>, vector<8x512xf32> -> vector<8x512xf32>
      %c0_35 = arith.constant 0 : index
      %c0_36 = arith.constant 0 : index
      %38 = vector.load %arg11[%c0_35, %c0_36] : memref<1x512xf32, #tpu.memory_space<vmem>>, vector<1x512xf32>
      %39 = vector.broadcast %38 : vector<1x512xf32> to vector<8x512xf32>
      %40 = arith.addf %37, %39 : vector<8x512xf32>
      %c0_37 = arith.constant 0 : index
      %c0_38 = arith.constant 0 : index
      %41 = vector.load %arg14[%c0_37, %c0_38] : memref<8x512xf32, #tpu.memory_space<vmem>>, vector<8x512xf32>
      tpu.vector_store %arg14[%c0_37, %c0_38], %40 {strides = array<i32>} : memref<8x512xf32, #tpu.memory_space<vmem>>, vector<8x512xf32>,
    } else {
    }
    %c0 = arith.constant 0 : index
    %c0_1 = arith.constant 0 : index
    %3 = vector.load %arg4[%c0, %c0_1] : memref<8x256xbf16, #tpu.memory_space<vmem>>, vector<8x256xbf16>
    %c0_2 = arith.constant 0 : index
    %c0_3 = arith.constant 0 : index
    %4 = vector.load %arg6[%c0_2, %c0_3] : memref<256x128xbf16, #tpu.memory_space<vmem>>, vector<256x128xbf16>
    %c0_4 = arith.constant 0 : index
    %c0_5 = arith.constant 0 : index
    %5 = vector.load %arg15[%c0_4, %c0_5] : memref<8x128xf32, #tpu.memory_space<vmem>>, vector<8x128xf32>
    %cst = arith.constant dense<0.000000e+00> : vector<8x128xf32>
    %6 = tpu.matmul %3, %4, %cst {dimension_numbers = #tpu.dot_dimension_numbers<[1], [0], [0], [1], [0, 0, 1, 1], [], []>} : vector<8x256xbf16>, vector<256x128xbf16>, vector<8x128xf32> -> vector<8x128xf32>
    %7 = arith.addf %5, %6 : vector<8x128xf32>
    %c0_6 = arith.constant 0 : index
    %c0_7 = arith.constant 0 : index
    %8 = vector.load %arg15[%c0_6, %c0_7] : memref<8x128xf32, #tpu.memory_space<vmem>>, vector<8x128xf32>
    tpu.vector_store %arg15[%c0_6, %c0_7], %7 {strides = array<i32>} : memref<8x128xf32, #tpu.memory_space<vmem>>, vector<8x128xf32>,
    %c0_8 = arith.constant 0 : index
    %c384 = arith.constant 384 : index
    %9 = vector.load %arg14[%c0_8, %c384] : memref<8x512xf32, #tpu.memory_space<vmem>>, vector<8x128xf32>
    %c0_9 = arith.constant 0 : index
    %c0_10 = arith.constant 0 : index
    %10 = vector.load %arg5[%c0_9, %c0_10] : memref<256x8xbf16, #tpu.memory_space<vmem>>, vector<256x8xbf16>
    %11 = arith.truncf %9 : vector<8x128xf32> to vector<8x128xbf16>
    %cst_11 = arith.constant dense<0.000000e+00> : vector<256x128xf32>
    %12 = tpu.matmul %10, %11, %cst_11 {dimension_numbers = #tpu.dot_dimension_numbers<[1], [0], [0], [1], [0, 0, 1, 1], [], []>} : vector<256x8xbf16>, vector<8x128xbf16>, vector<256x128xf32> -> vector<256x128xf32>
    %c0_12 = arith.constant 0 : index
    %c0_13 = arith.constant 0 : index
    %13 = vector.load %arg8[%c0_12, %c0_13] : memref<256x128xf32, #tpu.memory_space<vmem>>, vector<256x128xf32>
    %14 = arith.addf %12, %13 : vector<256x128xf32>
    %15 = arith.negf %14 : vector<256x128xf32>
    %16 = math.exp %15 : vector<256x128xf32>
    %cst_14 = arith.constant 1.000000e+00 : f32
    %17 = vector.broadcast %cst_14 : f32 to vector<256x128xf32>
    %18 = arith.addf %17, %16 : vector<256x128xf32>
    %19 = arith.divf %17, %18 : vector<256x128xf32>
    %c0_15 = arith.constant 0 : index
    %c0_16 = arith.constant 0 : index
    %20 = vector.load %arg7[%c0_15, %c0_16] : memref<256x128xbf16, #tpu.memory_space<vmem>>, vector<256x128xbf16>
    %21 = arith.extf %20 : vector<256x128xbf16> to vector<256x128xf32>
    %22 = arith.mulf %19, %21 : vector<256x128xf32>
    %c0_17 = arith.constant 0 : index
    %c0_18 = arith.constant 0 : index
    %23 = vector.load %arg16[%c0_17, %c0_18] : memref<8x128xf32, #tpu.memory_space<vmem>>, vector<8x128xf32>
    %24 = arith.truncf %22 : vector<256x128xf32> to vector<256x128xbf16>
    %cst_19 = arith.constant dense<0.000000e+00> : vector<8x128xf32>
    %25 = tpu.matmul %3, %24, %cst_19 {dimension_numbers = #tpu.dot_dimension_numbers<[1], [0], [0], [1], [0, 0, 1, 1], [], []>} : vector<8x256xbf16>, vector<256x128xbf16>, vector<8x128xf32> -> vector<8x128xf32>
    %26 = arith.addf %23, %25 : vector<8x128xf32>
    %c0_20 = arith.constant 0 : index
    %c0_21 = arith.constant 0 : index
    %27 = vector.load %arg16[%c0_20, %c0_21] : memref<8x128xf32, #tpu.memory_space<vmem>>, vector<8x128xf32>
    tpu.vector_store %arg16[%c0_20, %c0_21], %26 {strides = array<i32>} : memref<8x128xf32, #tpu.memory_space<vmem>>, vector<8x128xf32>,
    %c0_i32_22 = arith.constant 0 : i32
    %28 = arith.cmpi eq, %arg1, %c0_i32_22 : i32
    %29 = arith.extui %28 : i1 to i32
    %c0_i32_23 = arith.constant 0 : i32
    %30 = arith.cmpi ne, %29, %c0_i32_23 : i32
    scf.if %30 {
      %c0_24 = arith.constant 0 : index
      %c0_25 = arith.constant 0 : index
      %31 = vector.load %arg15[%c0_24, %c0_25] : memref<8x128xf32, #tpu.memory_space<vmem>>, vector<8x128xf32>
      %32 = arith.truncf %31 : vector<8x128xf32> to vector<8x128xbf16>
      %c0_26 = arith.constant 0 : index
      %c0_27 = arith.constant 0 : index
      %33 = vector.load %arg10[%c0_26, %c0_27] : memref<128x384xbf16, #tpu.memory_space<vmem>>, vector<128x384xbf16>
      %cst_28 = arith.constant dense<0.000000e+00> : vector<8x384xf32>
      %34 = tpu.matmul %32, %33, %cst_28 {dimension_numbers = #tpu.dot_dimension_numbers<[1], [0], [0], [1], [0, 0, 1, 1], [], []>} : vector<8x128xbf16>, vector<128x384xbf16>, vector<8x384xf32> -> vector<8x384xf32>
      %c0_29 = arith.constant 0 : index
      %c0_30 = arith.constant 0 : index
      %35 = vector.load %arg14[%c0_29, %c0_30] : memref<8x512xf32, #tpu.memory_space<vmem>>, vector<8x384xf32>
      %36 = arith.addf %35, %34 : vector<8x384xf32>
      %37 = vector.extract_strided_slice %36 {offsets = [0, 0], sizes = [8, 128], strides = [1, 1]} : vector<8x384xf32> to vector<8x128xf32>
      %38 = vector.extract_strided_slice %36 {offsets = [0, 128], sizes = [8, 128], strides = [1, 1]} : vector<8x384xf32> to vector<8x128xf32>
      %39 = vector.extract_strided_slice %36 {offsets = [0, 256], sizes = [8, 128], strides = [1, 1]} : vector<8x384xf32> to vector<8x128xf32>
      %40 = arith.negf %37 : vector<8x128xf32>
      %41 = math.exp %40 : vector<8x128xf32>
      %cst_31 = arith.constant 1.000000e+00 : f32
      %42 = vector.broadcast %cst_31 : f32 to vector<8x128xf32>
      %43 = arith.addf %42, %41 : vector<8x128xf32>
      %44 = arith.divf %42, %43 : vector<8x128xf32>
      %45 = math.tanh %39 : vector<8x128xf32>
      %46 = arith.mulf %44, %45 : vector<8x128xf32>
      %c0_32 = arith.constant 0 : index
      %c0_33 = arith.constant 0 : index
      %47 = vector.load %arg16[%c0_32, %c0_33] : memref<8x128xf32, #tpu.memory_space<vmem>>, vector<8x128xf32>
      %48 = arith.addf %46, %47 : vector<8x128xf32>
      %49 = arith.negf %38 : vector<8x128xf32>
      %50 = math.exp %49 : vector<8x128xf32>
      %cst_34 = arith.constant 1.000000e+00 : f32
      %51 = vector.broadcast %cst_34 : f32 to vector<8x128xf32>
      %52 = arith.addf %51, %50 : vector<8x128xf32>
      %53 = arith.divf %51, %52 : vector<8x128xf32>
      %54 = math.tanh %48 : vector<8x128xf32>
      %55 = arith.mulf %53, %54 : vector<8x128xf32>
      %56 = arith.truncf %48 : vector<8x128xf32> to vector<8x128xbf16>
      %c0_35 = arith.constant 0 : index
      %c0_36 = arith.constant 0 : index
      %57 = vector.load %arg12[%c0_35, %c0_36] : memref<8x128xbf16, #tpu.memory_space<vmem>>, vector<8x128xbf16>
      tpu.vector_store %arg12[%c0_35, %c0_36], %56 {strides = array<i32>} : memref<8x128xbf16, #tpu.memory_space<vmem>>, vector<8x128xbf16>,
      %58 = arith.truncf %55 : vector<8x128xf32> to vector<8x128xbf16>
      %c0_37 = arith.constant 0 : index
      %c0_38 = arith.constant 0 : index
      %59 = vector.load %arg13[%c0_37, %c0_38] : memref<8x128xbf16, #tpu.memory_space<vmem>>, vector<8x128xbf16>
      tpu.vector_store %arg13[%c0_37, %c0_38], %58 {strides = array<i32>} : memref<8x128xbf16, #tpu.memory_space<vmem>>, vector<8x128xbf16>,
    } else {
    }
    return
  }
  func.func @transform_0(%arg0: i32, %arg1: i32, %arg2: memref<1xi32, #tpu.memory_space<smem>>) -> (i32, i32) {
    %c0_i32 = arith.constant 0 : i32
    %c0_i32_0 = arith.constant 0 : i32
    return %arg0, %c0_i32 : i32, i32
  }
  func.func @transform_1(%arg0: i32, %arg1: i32, %arg2: memref<1xi32, #tpu.memory_space<smem>>) -> (i32, i32) {
    %c1_i32 = arith.constant 1 : i32
    %0 = arith.muli %arg0, %c1_i32 : i32
    %1 = arith.addi %0, %arg1 : i32
    %2 = arith.index_cast %1 : i32 to index
    %3 = memref.load %arg2[%2] : memref<1xi32, #tpu.memory_space<smem>>
    %c0_i32 = arith.constant 0 : i32
    return %arg0, %3 : i32, i32
  }
  func.func @transform_2(%arg0: i32, %arg1: i32, %arg2: memref<1xi32, #tpu.memory_space<smem>>) -> (i32, i32) {
    %c1_i32 = arith.constant 1 : i32
    %0 = arith.muli %arg0, %c1_i32 : i32
    %1 = arith.addi %0, %arg1 : i32
    %2 = arith.index_cast %1 : i32 to index
    %3 = memref.load %arg2[%2] : memref<1xi32, #tpu.memory_space<smem>>
    %c0_i32 = arith.constant 0 : i32
    return %3, %arg0 : i32, i32
  }
  func.func @transform_3(%arg0: i32, %arg1: i32, %arg2: memref<1xi32, #tpu.memory_space<smem>>) -> (i32, i32) {
    %c1_i32 = arith.constant 1 : i32
    %0 = arith.muli %arg0, %c1_i32 : i32
    %1 = arith.addi %0, %arg1 : i32
    %2 = arith.index_cast %1 : i32 to index
    %3 = memref.load %arg2[%2] : memref<1xi32, #tpu.memory_space<smem>>
    %c0_i32 = arith.constant 0 : i32
    %c0_i32_0 = arith.constant 0 : i32
    return %3, %c0_i32 : i32, i32
  }
  func.func @transform_4(%arg0: i32, %arg1: i32, %arg2: memref<1xi32, #tpu.memory_space<smem>>) -> (i32, i32) {
    %c1_i32 = arith.constant 1 : i32
    %0 = arith.muli %arg0, %c1_i32 : i32
    %1 = arith.addi %0, %arg1 : i32
    %2 = arith.index_cast %1 : i32 to index
    %3 = memref.load %arg2[%2] : memref<1xi32, #tpu.memory_space<smem>>
    %c0_i32 = arith.constant 0 : i32
    %c0_i32_0 = arith.constant 0 : i32
    return %3, %c0_i32 : i32, i32
  }
  func.func @transform_5(%arg0: i32, %arg1: i32, %arg2: memref<1xi32, #tpu.memory_space<smem>>) -> (i32, i32) {
    %c1_i32 = arith.constant 1 : i32
    %0 = arith.muli %arg0, %c1_i32 : i32
    %1 = arith.addi %0, %arg1 : i32
    %2 = arith.index_cast %1 : i32 to index
    %3 = memref.load %arg2[%2] : memref<1xi32, #tpu.memory_space<smem>>
    %c0_i32 = arith.constant 0 : i32
    %c0_i32_0 = arith.constant 0 : i32
    return %3, %c0_i32 : i32, i32
  }
  func.func @transform_6(%arg0: i32, %arg1: i32, %arg2: memref<1xi32, #tpu.memory_space<smem>>) -> (i32, i32) {
    %c0_i32 = arith.constant 0 : i32
    %c0_i32_0 = arith.constant 0 : i32
    %c0_i32_1 = arith.constant 0 : i32
    return %c0_i32, %c0_i32_0 : i32, i32
  }
  func.func @transform_7(%arg0: i32, %arg1: i32, %arg2: memref<1xi32, #tpu.memory_space<smem>>) -> (i32, i32) {
    %c0_i32 = arith.constant 0 : i32
    %c0_i32_0 = arith.constant 0 : i32
    %c0_i32_1 = arith.constant 0 : i32
    return %c0_i32, %c0_i32_0 : i32, i32
  }
  func.func @transform_8(%arg0: i32, %arg1: i32, %arg2: memref<1xi32, #tpu.memory_space<smem>>) -> (i32, i32) {
    %c0_i32 = arith.constant 0 : i32
    %c0_i32_0 = arith.constant 0 : i32
    %c0_i32_1 = arith.constant 0 : i32
    return %c0_i32, %c0_i32_0 : i32, i32
  }
  func.func @transform_9(%arg0: i32, %arg1: i32, %arg2: memref<1xi32, #tpu.memory_space<smem>>) -> (i32, i32) {
    %c0_i32 = arith.constant 0 : i32
    %c0_i32_0 = arith.constant 0 : i32
    return %arg0, %c0_i32 : i32, i32
  }
  func.func @transform_10(%arg0: i32, %arg1: i32, %arg2: memref<1xi32, #tpu.memory_space<smem>>) -> (i32, i32) {
    %c0_i32 = arith.constant 0 : i32
    %c0_i32_0 = arith.constant 0 : i32
    return %arg0, %c0_i32 : i32, i32
  }
}

</mosaic_0001>

<bundles_post_ra>
// kernel: tpu_custom_call.1
= control target key start
LH: loop header
LB: loop body
LE: loop exit
PB: predicated region body
PF: predicated region fallthrough
CT: control target
= control target key end

     0   :  { %18 = vsyncpa [#allocation8], 0  ;;  %s2848_s0 = inlined_call_operand.<no memory space> [shape: s32[1], index: 0, kind: input, shape index: {}]   ;;  %s2849_s1 = inlined_call_operand.vmem [shape: bf16[8,128], index: 1, kind: input, shape index: {}]   ;;  %s2850_s2 = inlined_call_operand.vmem [shape: bf16[8,512], index: 2, kind: input, shape index: {}]   ;;  %s2851_s3 = inlined_call_operand.vmem [shape: bf16[512,8], index: 3, kind: input, shape index: {}]   ;;  %s2852_s4 = inlined_call_operand.vmem [shape: bf16[512,128], index: 4, kind: input, shape index: {}]   ;;  %s2853_s5 = inlined_call_operand.hbm [shape: bf16[512,128], index: 5, kind: input, shape index: {}]   ;;  %s2854_s6 = inlined_call_operand.hbm [shape: f32[512,128], index: 6, kind: input, shape index: {}]   ;;  %s2855_s7 = inlined_call_operand.hbm [shape: bf16[128,512], index: 7, kind: input, shape index: {}]   ;;  %s2856_s8 = inlined_call_operand.hbm [shape: bf16[128,384], index: 8, kind: input, shape index: {}]   ;;  %s2857_s9 = inlined_call_operand.vmem [shape: f32[1,512], index: 9, kind: input, shape index: {}]   ;;  %s2858_s10 = inlined_call_operand.hbm [shape: bf16[8,128], index: 10, kind: output, shape index: {0}]   ;;  %s2859_s11 = inlined_call_operand.hbm [shape: bf16[8,128], index: 11, kind: output, shape index: {1}]  }
   0x1   :  { %19 = vsyncpa [#allocation11], 0 }
   0x2   :  { %20 = vsyncpa [#allocation14], 0 }
   0x3   :  { %21 = vsyncpa [#allocation9], 0  ;;  %s1862_s19 = sshll.u32 %s2848_s0, 12 }
   0x4   :  { %22 = vsyncpa [#allocation17], 0  ;;  %s87_s22 = scalar_lea.hbm %s2854_s6, %s1862_s19  ;;  %s2491_s23 = smov [#allocation10]  }
   0x5   :  { %s88_s24 = sshll.u32 %s2491_s23, 4  ;;  %s1861_s27 = sshll.u32 %s2848_s0, 11  ;;  %s89_s24 = int_to_ptr.vmem [resolvable:$true] %s88_s24 }
   0x6   :  { %s2345_s28 = scalar_lea.hbm %s87_s22, 4096  ;;  %s2347_s12 = scalar_lea.hbm %s2854_s6, 8192 }
   0x7   :  { %p2346_p0 = scmp.ne.s32.totalorder %s87_s22, %s2345_s28  ;;  %p2348_p1 = scmp.lt.u32.totalorder %s87_s22, %s2854_s6 }
   0x8   :  { %p2349_p2 = scmp.lt.u32.totalorder %s2347_s12, %s2345_s28  ;;  %p2351_p4 = scmp.lt.u32.totalorder %s2345_s28, %s87_s22 }
   0xa   :  { %p2350_p3 = por %p2349_p2, %p2348_p1 }
   0xc   :  { %p2352_p5 = por %p2351_p4, %p2350_p3 }
   0xe   :  { %p2353_p6 = pnand %p2352_p5, %p2346_p0 }
  0x10   :  { %2356 = shalt.err (!%p2353_p6)
}
  0x11   :  { %s2357_s15 = scalar_lea.vmem %s89_s24, 4096  ;;  %p2362_p8 = scmp.lt.s32.totalorder %s89_s24, %s89_s24 }
  0x12   :  { %p2358_p7 = scmp.ne.s32.totalorder %s89_s24, %s2357_s15  ;;  %p2363_p9 = scmp.lt.s32.totalorder %s2357_s15, %s2357_s15 }
  0x14   :  { %p2364_p10 = por %p2363_p9, %p2362_p8 }
  0x16   :  { %p2365_p11 = pnand %p2364_p10, %p2358_p7 }
  0x18   :  { %2368 = shalt.err (!%p2365_p11)
}
  0x19   :  { %s2492_s16 = smov 128   ;;  %s2493_s17 = smov 8  }
  0x1a   :  { %94 = dma.hbm_to_vmem [thread:$0]  %s87_s22, 4096, %s89_s24, [#allocation11], %s2492_s16, %s2492_s16, %s2493_s17  }
  0x1b   :  { %s70_s6 = scalar_lea.hbm %s2853_s5, %s1861_s27  ;;  %s2494_s20 = smov [#allocation7]  }
  0x1c   :  { %s71_s21 = sshll.u32 %s2494_s20, 4  ;;  %s2369_s23 = scalar_lea.hbm %s70_s6, 2048  ;;  %s72_s21 = int_to_ptr.vmem [resolvable:$true] %s71_s21 }
  0x1d   :  { %p2370_p12 = scmp.ne.s32.totalorder %s70_s6, %s2369_s23  ;;  %s2371_s28 = scalar_lea.hbm %s2853_s5, 4096 }
  0x1e   :  { %p2372_p13 = scmp.lt.u32.totalorder %s70_s6, %s2853_s5  ;;  %p2373_p0 = scmp.lt.u32.totalorder %s2371_s28, %s2369_s23 }
  0x1f   :  { %p2375_p2 = scmp.lt.u32.totalorder %s2369_s23, %s70_s6 }
  0x20   :  { %p2374_p1 = por %p2373_p0, %p2372_p13 }
  0x22   :  { %p2376_p3 = por %p2375_p2, %p2374_p1 }
  0x24   :  { %p2377_p4 = pnand %p2376_p3, %p2370_p12 }
  0x26   :  { %2380 = shalt.err (!%p2377_p4)
}
  0x27   :  { %s2381_s22 = scalar_lea.vmem %s72_s21, 2048  ;;  %p2386_p6 = scmp.lt.s32.totalorder %s72_s21, %s72_s21 }
  0x28   :  { %p2382_p5 = scmp.ne.s32.totalorder %s72_s21, %s2381_s22  ;;  %p2387_p7 = scmp.lt.s32.totalorder %s2381_s22, %s2381_s22 }
  0x2a   :  { %p2388_p8 = por %p2387_p7, %p2386_p6 }
  0x2c   :  { %p2389_p9 = pnand %p2388_p8, %p2382_p5 }
  0x2e   :  { %2392 = shalt.err (!%p2389_p9)
}
  0x2f   :  { %s2495_s24 = smov 64   ;;  %s2496_s27 = smov 4  }
  0x30   :  { %77 = dma.hbm_to_vmem [thread:$0]  %s70_s6, 2048, %s72_s21, [#allocation8], %s2495_s24, %s2495_s24, %s2496_s27  }
  0x31   :  { %s2497_s12 = smov [#allocation12]   ;;  %s2393_s15 = scalar_lea.hbm %s2855_s7, 4096 }
  0x32   :  { %s100_s13 = sshll.u32 %s2497_s12, 4  ;;  %p2394_p10 = scmp.ne.s32.totalorder %s2855_s7, %s2393_s15  ;;  %s101_s13 = int_to_ptr.vmem [resolvable:$true] %s100_s13 }
  0x33   :  { %p2397_p11 = scmp.lt.u32.totalorder %s2393_s15, %s2855_s7 }
  0x35   :  { %p2399_p12 = pnand %p2397_p11, %p2394_p10 }
  0x37   :  { %2402 = shalt.err (!%p2399_p12)
}
  0x38   :  { %s2403_s20 = scalar_lea.vmem %s101_s13, 4096  ;;  %p2408_p0 = scmp.lt.s32.totalorder %s101_s13, %s101_s13 }
  0x39   :  { %p2404_p13 = scmp.ne.s32.totalorder %s101_s13, %s2403_s20  ;;  %p2409_p1 = scmp.lt.s32.totalorder %s2403_s20, %s2403_s20 }
  0x3b   :  { %p2410_p2 = por %p2409_p1, %p2408_p0 }
  0x3d   :  { %p2411_p3 = pnand %p2410_p2, %p2404_p13 }
  0x3f   :  { %2414 = shalt.err (!%p2411_p3)
}
  0x40   :  { %s2498_s6 = smov 256   ;;  %s2499_s21 = smov 16  }
  0x41   :  { %106 = dma.hbm_to_vmem [thread:$0]  %s2855_s7, 4096, %s101_s13, [#allocation11], %s2498_s6, %s2498_s6, %s2499_s21  }
  0x42   :  { %s2500_s26 = smov [#allocation13]   ;;  %s2415_s22 = scalar_lea.hbm %s2856_s8, 3072 }
  0x43   :  { %s112_s28 = sshll.u32 %s2500_s26, 4  ;;  %p2416_p4 = scmp.ne.s32.totalorder %s2856_s8, %s2415_s22  ;;  %s113_s28 = int_to_ptr.vmem [resolvable:$true] %s112_s28 }
  0x44   :  { %p2419_p5 = scmp.lt.u32.totalorder %s2415_s22, %s2856_s8 }
  0x46   :  { %p2421_p6 = pnand %p2419_p5, %p2416_p4 }
  0x48   :  { %2424 = shalt.err (!%p2421_p6)
}
  0x49   :  { %s2425_s14 = scalar_lea.vmem %s113_s28, 3072  ;;  %p2430_p8 = scmp.lt.s32.totalorder %s113_s28, %s113_s28 }
  0x4a   :  { %p2426_p7 = scmp.ne.s32.totalorder %s113_s28, %s2425_s14  ;;  %p2431_p9 = scmp.lt.s32.totalorder %s2425_s14, %s2425_s14 }
  0x4c   :  { %p2432_p10 = por %p2431_p9, %p2430_p8 }
  0x4e   :  { %p2433_p11 = pnand %p2432_p10, %p2426_p7 }
  0x50   :  { %2436 = shalt.err (!%p2433_p11)
}
  0x51   :  { %s2501_s7 = smov 192   ;;  %s2502_s13 = smov 12  }
  0x52   :  { %118 = dma.hbm_to_vmem [thread:$0]  %s2856_s8, 3072, %s113_s28, [#allocation14], %s2501_s7, %s2501_s7, %s2502_s13  }
  0x53   :  { %2481 = dma.done.wait [#allocation8], 2048  }
  0x54   :  { %2482 = vsyncadd [#allocation8], 4294965248 }
  0x55   :  { %2483 = dma.done.wait [#allocation11], 8192  }
  0x56   :  { %2484 = vsyncadd [#allocation11], 4294959104 }
  0x57   :  { %2485 = dma.done.wait [#allocation14], 3072  }
  0x58   :  { %2486 = vsyncadd [#allocation14], 4294964224  ;;  %v2503_v0 = vmov 0   ;;  %v2090_v1 = vld [vmem:[#allocation12 + $0xc] ss:$16 sps:$4 sm:$0xff]   ;;  %s1717_s18 = sshll.u32 %s2848_s0, 5  ;;  %v232_v54 = vlaneseq }
  0x59   :  { %485 = vmatprep.mubr.bf16.mxu1 %v2503_v0  ;;  %444 = vmatprep.mubr.bf16.mxu0 %v2503_v0  ;;  %v2092_v2 = vld [vmem:[#allocation12 + $0x8] ss:$16 sps:$4 sm:$0xff]   ;;  %v2093_v3 = vld [vmem:[#allocation12 + $0x2c] ss:$16 sps:$4 sm:$0xff]   ;;  %p167_p12 = scmp.lt.s32.totalorder %s1717_s18, 63  ;;  %s1715_s21 = sshll.u32 %s2848_s0, 1 }
  0x5a   :  { %453 = vmatprep.subr.bf16.mxu1 %v2090_v1  ;;  %v2095_v4 = vld [vmem:[#allocation12 + $0x28] ss:$16 sps:$4 sm:$0xff]   ;;  %v2096_v5 = vld [vmem:[#allocation12 + $0x4c] ss:$16 sps:$4 sm:$0xff]   ;;  %v2114_v10 = vld [vmem:[#allocation12 + $0x4] ss:$16 sps:$4 sm:$0xff]  }
  0x5b   :  { %454 = vmatpush1.bf16.msra.mxu1 %v2092_v2  ;;  %v2098_v6 = vld [vmem:[#allocation12 + $0x48] ss:$16 sps:$4 sm:$0xff]   ;;  %v2099_v7 = vld [vmem:[#allocation12 + $0x6c] ss:$16 sps:$4 sm:$0xff]   ;;  %v2116_v11 = vld [vmem:[#allocation12] ss:$16 sps:$4 sm:$0xff]   ;;  %412 = vmatprep.subr.bf16.mxu0 %v2114_v10 }
  0x5c   :  { %455 = vmatprep.subr.bf16.mxu1 %v2093_v3  ;;  %v2101_v8 = vld [vmem:[#allocation12 + $0x68] ss:$16 sps:$4 sm:$0xff]   ;;  %v2102_v9 = vld [vmem:[#allocation12 + $0x8c] ss:$16 sps:$4 sm:$0xff]   ;;  %v2117_v12 = vld [vmem:[#allocation12 + $0x24] ss:$16 sps:$4 sm:$0xff]   ;;  %413 = vmatpush1.bf16.msra.mxu0 %v2116_v11 }
  0x5d   :  { %s2862_s18 = smov (!%p167_p12, %s1717_s18), 63  ;;  %v2104_v13 = vld [vmem:[#allocation12 + $0x88] ss:$16 sps:$4 sm:$0xff]   ;;  %v2119_v14 = vld [vmem:[#allocation12 + $0x20] ss:$16 sps:$4 sm:$0xff]   ;;  %414 = vmatprep.subr.bf16.mxu0 %v2117_v12  ;;  %p2634_p13 = scmp.lt.s32.totalorder %s1715_s21, 3 }
  0x5e   :  { %v2120_v15 = vld [vmem:[#allocation12 + $0x44] ss:$16 sps:$4 sm:$0xff]   ;;  %v2105_v16 = vld [vmem:[#allocation12 + $0xac] ss:$16 sps:$4 sm:$0xff]   ;;  %s1718_s19 = sshll.u32 %s2862_s18, 2  ;;  %vm823_vm0 = vcmask 64512  }
  0x5f   :  { %456 = vmatpush1.bf16.msra.mxu1 %v2095_v4  ;;  %v2107_v17 = vld [vmem:[#allocation12 + $0xa8] ss:$16 sps:$4 sm:$0xff]   ;;  %v2122_v18 = vld [vmem:[#allocation12 + $0x40] ss:$16 sps:$4 sm:$0xff]   ;;  %v2123_v19 = vld [vmem:[#allocation12 + $0x64] ss:$16 sps:$4 sm:$0xff]   ;;  %s2632_s26 = scalar_lea.vmem %s2852_s4, %s1718_s19  ;;  %s2651_s12 = scalar_lea.vmem %s2851_s3, %s1718_s19 }
  0x60   :  { %457 = vmatprep.subr.bf16.mxu1 %v2096_v5  ;;  %415 = vmatpush1.bf16.msra.mxu0 %v2119_v14  ;;  %v2108_v20 = vld [vmem:[#allocation12 + $0xcc] ss:$16 sps:$4 sm:$0xff]   ;;  %v2110_v21 = vld [vmem:[#allocation12 + $0xc8] ss:$16 sps:$4 sm:$0xff]   ;;  %v2125_v22 = vld [vmem:[#allocation12 + $0x60] ss:$16 sps:$4 sm:$0xff]  }
  0x61   :  { %416 = vmatprep.subr.bf16.mxu0 %v2120_v15  ;;  %v2126_v23 = vld [vmem:[#allocation12 + $0x84] ss:$16 sps:$4 sm:$0xff]   ;;  %v2111_v24 = vld [vmem:[#allocation12 + $0xec] ss:$16 sps:$4 sm:$0xff]   ;;  %v2113_v25 = vld [vmem:[#allocation12 + $0xe8] ss:$16 sps:$4 sm:$0xff]  }
  0x62   :  { %v2128_v26 = vld [vmem:[#allocation12 + $0x80] ss:$16 sps:$4 sm:$0xff]   ;;  %v2129_v27 = vld [vmem:[#allocation12 + $0xa4] ss:$16 sps:$4 sm:$0xff]   ;;  %s2864_s21 = smov (!%p2634_p13, %s1715_s21), 3  ;;  %v2140_v37 = vld [vmem:[%s2632_s26 + $0x48] sm:$0xff]  }
  0x63   :  { %458 = vmatpush1.bf16.msra.mxu1 %v2098_v6  ;;  %v197_v28 = vld [vmem:[%s2849_s1] sm:$0xf]  ;;  %v2132_v30 = vld [vmem:[#allocation12 + $0xc4] ss:$16 sps:$4 sm:$0xff]   ;;  %s1716_s29 = sshll.u32 %s2864_s21, 2  ;;  %v2141_v39 = vld [vmem:[%s2632_s26 + $0x8] sm:$0xff]  }
  0x64   :  { %459 = vmatprep.subr.bf16.mxu1 %v2099_v7  ;;  %417 = vmatpush1.bf16.msra.mxu0 %v2122_v18  ;;  %v2131_v29 = vld [vmem:[#allocation12 + $0xa0] ss:$16 sps:$4 sm:$0xff]   ;;  %v2135_v32 = vld [vmem:[#allocation12 + $0xe4] ss:$16 sps:$4 sm:$0xff]   ;;  %s160_s24 = scalar_lea.vmem %s2850_s2, %s1716_s29  ;;  %v2144_v42 = vld [vmem:[%s2632_s26 + $0x58] sm:$0xff]   ;;  %v2674_v55 = vshrl.u32 %v232_v54, 7 }
  0x65   :  { %418 = vmatprep.subr.bf16.mxu0 %v2123_v19  ;;  %v2134_v31 = vld [vmem:[#allocation12 + $0xc0] ss:$16 sps:$4 sm:$0xff]   ;;  %v2145_v43 = vld [vmem:[%s2632_s26 + $0x18] sm:$0xff]   ;;  %v2148_v46 = vld [vmem:[%s2632_s26 + $0x68] sm:$0xff]   ;;  %vm872_vm1 = vcmask 1043456   ;;  %v2504_v6 = vmov 0.0  }
  0x66   :  { %v2137_v33 = vld [vmem:[#allocation12 + $0xe0] ss:$16 sps:$4 sm:$0xff]   ;;  %v2149_v47 = vld [vmem:[%s2632_s26 + $0x28] sm:$0xff]   ;;  %v2152_v50 = vld [vmem:[%s2632_s26 + $0x78] sm:$0xff]   ;;  %v246_v56 = vsub.s32 3, %v2674_v55  ;;  %vm2505_vm2 = vmmov 0  }
  0x67   :  { %460 = vmatpush1.bf16.msra.mxu1 %v2101_v8  ;;  %v2138_v34 = vld [vmem:[%s2632_s26 + $0x40] sm:$0xff]   ;;  %v2142_v40 = vld [vmem:[%s2632_s26 + $0x50] sm:$0xff]   ;;  %v2153_v51 = vld [vmem:[%s2632_s26 + $0x38] sm:$0xff]  }
  0x68   :  { %461 = vmatprep.subr.bf16.mxu1 %v2102_v9  ;;  %419 = vmatpush1.bf16.msra.mxu0 %v2125_v22  ;;  %v498_v35 = vld [vmem:[%s160_s24] sm:$0xff]  ;;  %v2143_v41 = vld [vmem:[%s2632_s26 + $0x10] sm:$0xff]   ;;  %v2157_v3 = vld [vmem:[%s2651_s12 + $0x8] sm:$0xff]  }
  0x69   :  { %420 = vmatprep.subr.bf16.mxu0 %v2126_v23  ;;  %v2139_v36 = vld [vmem:[%s2632_s26] sm:$0xff]   ;;  %v1754_v38 = vcombine.high %v498_v35, %v498_v35  ;;  %v2150_v48 = vld [vmem:[%s2632_s26 + $0x70] sm:$0xff]   ;;  %v2669_v52 = vcombine.low %v498_v35, %v498_v35  ;;  %v2159_v8 = vld [vmem:[%s2651_s12 + $0x18] sm:$0xff]  }
  0x6a   :  { %v2146_v44 = vld [vmem:[%s2632_s26 + $0x60] sm:$0xff]   ;;  %v2151_v49 = vld [vmem:[%s2632_s26 + $0x30] sm:$0xff]   ;;  %v2161_v12 = vld [vmem:[%s2651_s12 + $0x28] sm:$0xff]  }
  0x6b   :  { %462 = vmatpush1.bf16.msra.mxu1 %v2104_v13  ;;  %v2147_v45 = vld [vmem:[%s2632_s26 + $0x20] sm:$0xff]   ;;  %v2158_v4 = vld [vmem:[%s2651_s12 + $0x10] sm:$0xff]  }
  0x6c   :  { %463 = vmatprep.subr.bf16.mxu1 %v2105_v16  ;;  %421 = vmatpush1.bf16.msra.mxu0 %v2128_v26  ;;  %v2156_v53 = vld [vmem:[%s2651_s12] sm:$0xff]   ;;  %v2166_v5 = vld [vmem:[#allocation13 + $0x8] ss:$12 sps:$4 sm:$0xff]   ;;  %v2171_v11 = vld [vmem:[#allocation13 + $0x50] ss:$12 sps:$4 sm:$0xff]  }
  0x6d   :  { %422 = vmatprep.subr.bf16.mxu0 %v2129_v27  ;;  %v2680_v57 = vld [vmem:[%s2857_s9] sm:$0xf]  ;;  %v2170_v10 = vld [vmem:[#allocation13 + $0x38] ss:$12 sps:$4 sm:$0xff]   ;;  %v2162_v13 = vld [vmem:[%s2651_s12 + $0x30] sm:$0xff]  }
  0x6e   :  { %v247_v58 = vrot.slane %v2680_v57, %v246_v56  ;;  %v2167_v7 = vld [vmem:[#allocation13 + $0x20] ss:$12 sps:$4 sm:$0xff]   ;;  %v2174_v14 = vld [vmem:[#allocation13 + $0x68] ss:$12 sps:$4 sm:$0xff]   ;;  %v2163_v16 = vld [vmem:[%s2651_s12 + $0x38] sm:$0xff]  }
  0x6f   :  { %464 = vmatpush1.bf16.msra.mxu1 %v2107_v17  ;;  %v2160_v9 = vld [vmem:[%s2651_s12 + $0x20] sm:$0xff]   ;;  %v2179_v19 = vld [vmem:[#allocation13 + $0xb0] ss:$12 sps:$4 sm:$0xff]  }
  0x70   :  { %465 = vmatprep.subr.bf16.mxu1 %v2108_v20  ;;  %423 = vmatpush1.bf16.msra.mxu0 %v2131_v29  ;;  %v2175_v15 = vld [vmem:[#allocation13 + $0x80] ss:$12 sps:$4 sm:$0xff]   ;;  %v2178_v18 = vld [vmem:[#allocation13 + $0x98] ss:$12 sps:$4 sm:$0xff]  }
  0x71   :  { %424 = vmatprep.subr.bf16.mxu0 %v2132_v30  ;;  %v2164_v17 = vld [vmem:[%s2651_s12 + $0x40] sm:$0xff]   ;;  %v2165_v20 = vld [vmem:[%s2651_s12 + $0x48] sm:$0xff]   ;;  %v2169_v26 = vld [vmem:[%s2651_s12 + $0x58] sm:$0xff]  }
  0x72   :  { %v2173_v29 = vld [vmem:[%s2651_s12 + $0x68] sm:$0xff]   ;;  %v2176_v30 = vld [vmem:[%s2651_s12 + $0x70] sm:$0xff]  }
  0x73   :  { %466 = vmatpush1.bf16.msra.mxu1 %v2110_v21  ;;  %v2168_v21 = vld [vmem:[%s2651_s12 + $0x50] sm:$0xff]  }
  0x74   :  { %467 = vmatprep.subr.bf16.mxu1 %v2111_v24  ;;  %425 = vmatpush1.bf16.msra.mxu0 %v2134_v31  ;;  %v2177_v31 = vld [vmem:[%s2651_s12 + $0x78] sm:$0xff]  }
  0x75   :  { %426 = vmatprep.subr.bf16.mxu0 %v2135_v32 }
  0x77   :  { %468 = vmatpush1.bf16.msra.mxu1 %v2113_v25 }
  0x78   :  { %427 = vmatpush1.bf16.msra.mxu0 %v2137_v33  ;;  %v713_v33 = vld [vmem:[#allocation10 + $0x10] sm:$0xff] }
  0x79   :  { %1942 = vmatprep.subr.bf16.mxu0 %v2138_v34  ;;  %v711_v34 = vld [vmem:[#allocation10] sm:$0xff] }
  0x7a   :  { %486 = vmatmul.mubr.bf16.vlgmr.msra.gmra.mrb[0].mxu1 %v197_v28 }
  0x7b   :  { %445 = vmatmul.mubr.bf16.vlgmr.msra.gmra.mrb[0].mxu0 %v197_v28  ;;  %2014 = vmatprep.mubr.msk.bf16.mxu1 %vm823_vm0, %v2156_v53  ;;  %v2172_v28 = vld [vmem:[%s2651_s12 + $0x60] sm:$0xff]   ;;  %v718_v53 = vld [vmem:[#allocation10 + $0x38] sm:$0xff] }
  0x7c   :  { %1943 = vmatpush3.bf16.msra.mxu0 %v2139_v36  ;;  %667 = vmatprep.mubr.bf16.mxu0 %v1754_v38  ;;  %v714_v36 = vld [vmem:[#allocation10 + $0x18] sm:$0xff] }
  0x7d   :  { %1944 = vmatprep.subr.bf16.mxu0 %v2140_v37 }
  0x80   :  { %1945 = vmatpush3.bf16.msra.mxu0 %v2141_v39  ;;  %v712_v39 = vld [vmem:[#allocation10 + $0x8] sm:$0xff] }
  0x81   :  { %1946 = vmatprep.subr.bf16.mxu0 %v2142_v40 }
  0x84   :  { %1947 = vmatpush3.bf16.msra.mxu0 %v2143_v41 }
  0x85   :  { %1948 = vmatprep.subr.bf16.mxu0 %v2144_v42 }
  0x88   :  { %1949 = vmatpush3.bf16.msra.mxu0 %v2145_v43 }
  0x89   :  { %1950 = vmatprep.subr.bf16.mxu0 %v2146_v44 }
  0x8c   :  { %1951 = vmatpush3.bf16.msra.mxu0 %v2147_v45 }
  0x8d   :  { %1952 = vmatprep.subr.bf16.mxu0 %v2148_v46 }
  0x90   :  { %1953 = vmatpush3.bf16.msra.mxu0 %v2149_v47 }
  0x91   :  { %1954 = vmatprep.subr.bf16.mxu0 %v2150_v48 }
  0x94   :  { %1955 = vmatpush3.bf16.msra.mxu0 %v2151_v49  ;;  %v717_v49 = vld [vmem:[#allocation10 + $0x30] sm:$0xff] }
  0x95   :  { %1956 = vmatprep.subr.bf16.mxu0 %v2152_v50  ;;  %v715_v50 = vld [vmem:[#allocation10 + $0x20] sm:$0xff] }
  0x98   :  { %1957 = vmatpush3.bf16.msra.mxu0 %v2153_v51 }
  0x9b   :  { %668 = vmatmul.mubr.bf16.vlgmr.msra.gmra.mrb[4].mxu0 %v2669_v52 }
  0x9c   :  { %1374 = vmatprep.mubr.bf16.mxu0 %v1754_v38 }
 0x14d   :  { %v2683_v59 = vpop.f32.mrb[0].mxu1 }
 0x14e   :  { %v489_v60 = vpop.f32.mrb[1].mxu1 }
 0x14f   :  { %v490_v61 = vadd.f32 %v489_v60, %v247_v58  ;;  %v491_v62 = vpop.f32.mrb[2].mxu1  ;;  %v716_v58 = vld [vmem:[#allocation10 + $0x28] sm:$0xff] }
 0x150   :  { %v492_v63 = vpop.f32.mrb[3].mxu1 }
 0x151   :  { %v710_v1 = vpack.c.bf16 %v490_v61, %v490_v61 }
 0x153   :  { %v874_v2 = vsel %vm872_vm1, %v710_v1, 0  ;;  %2072 = vmatprep.subr.msk.bf16.mxu1 %vm872_vm1, %v710_v1 }
 0x154   :  { %2013 = vmatpush3.bf16.msra.mxu1 %v874_v2 }
 0x155   :  { %2046 = vmatprep.subr.bf16.mxu1 %v2504_v6 }
 0x157   :  { %2015 = vmatmul.mubr.msk.bf16.vlgmr.msra.gmra.mrb[4].mxu1 %vm823_vm0, %v2157_v3 }
 0x158   :  { %2018 = vmatprep.mubr.msk.bf16.mxu1 %vm823_vm0, %v2158_v4  ;;  %2047 = vmatpush3.bf16.msra.mxu1 %v2166_v5 }
 0x159   :  { %2048 = vmatprep.subr.bf16.mxu1 %v2504_v6 }
 0x15c   :  { %2049 = vmatpush3.bf16.msra.mxu1 %v2167_v7 }
 0x15d   :  { %2050 = vmatprep.subr.bf16.mxu1 %v2504_v6 }
 0x15f   :  { %2019 = vmatmul.mubr.msk.bf16.gmra.mrb[8].mxu1 %vm823_vm0, %v2159_v8  ;;  %v719_v8 = vld [vmem:[#allocation10 + $0x40] sm:$0xff] }
 0x160   :  { %2022 = vmatprep.mubr.msk.bf16.mxu1 %vm823_vm0, %v2160_v9  ;;  %2051 = vmatpush3.bf16.msra.mxu1 %v2170_v10 }
 0x161   :  { %2052 = vmatprep.subr.bf16.mxu1 %v2504_v6 }
 0x164   :  { %2053 = vmatpush3.bf16.msra.mxu1 %v2171_v11 }
 0x165   :  { %2054 = vmatprep.subr.bf16.mxu1 %v2504_v6 }
 0x167   :  { %2023 = vmatmul.mubr.msk.bf16.gmra.mrb[12].mxu1 %vm823_vm0, %v2161_v12  ;;  %v722_v12 = vld [vmem:[#allocation10 + $0x58] sm:$0xff] }
 0x168   :  { %2026 = vmatprep.mubr.msk.bf16.mxu1 %vm823_vm0, %v2162_v13  ;;  %2055 = vmatpush3.bf16.msra.mxu1 %v2174_v14 }
 0x169   :  { %2056 = vmatprep.subr.bf16.mxu1 %v2504_v6 }
 0x16c   :  { %2057 = vmatpush3.bf16.msra.mxu1 %v2175_v15 }
 0x16d   :  { %2058 = vmatprep.subr.bf16.mxu1 %v2504_v6 }
 0x16e   :  { %v1958_v22 = vpop.f32.mrb[4].mxu0 }
 0x16f   :  { %2027 = vmatmul.mubr.msk.bf16.gmra.mrb[16].mxu1 %vm823_vm0, %v2163_v16  ;;  %v1959_v23 = vpop.f32.mrb[5].mxu0 }
 0x170   :  { %2030 = vmatprep.mubr.msk.bf16.mxu1 %vm823_vm0, %v2164_v17  ;;  %2059 = vmatpush3.bf16.msra.mxu1 %v2178_v18  ;;  %v1960_v24 = vadd.f32 %v1959_v23, %v1958_v22  ;;  %v1961_v25 = vpop.f32.mrb[6].mxu0  ;;  %v720_v17 = vld [vmem:[#allocation10 + $0x48] sm:$0xff] }
 0x171   :  { %2060 = vmatprep.subr.bf16.mxu1 %v2504_v6  ;;  %v1962_v27 = vpop.f32.mrb[7].mxu0 }
 0x172   :  { %v2715_v32 = vpack.c.bf16 %v1960_v24, %v1960_v24 }
 0x174   :  { %2061 = vmatpush3.bf16.msra.mxu1 %v2179_v19 }
 0x177   :  { %2031 = vmatmul.mubr.msk.bf16.gmra.mrb[20].mxu1 %vm823_vm0, %v2165_v20 }
 0x178   :  { %2034 = vmatprep.mubr.msk.bf16.mxu1 %vm823_vm0, %v2168_v21 }
 0x17f   :  { %2035 = vmatmul.mubr.msk.bf16.gmra.mrb[24].mxu1 %vm823_vm0, %v2169_v26 }
 0x180   :  { %2038 = vmatprep.mubr.msk.bf16.mxu1 %vm823_vm0, %v2172_v28 }
 0x187   :  { %2039 = vmatmul.mubr.msk.bf16.gmra.mrb[28].mxu1 %vm823_vm0, %v2173_v29  ;;  %v1927_v29 = vld [vmem:[#allocation7 + $0x8] sm:$0xff]  }
 0x188   :  { %2042 = vmatprep.mubr.msk.bf16.mxu1 %vm823_vm0, %v2176_v30 }
 0x18f   :  { %2043 = vmatmul.mubr.msk.bf16.gmra.mrb[32].mxu1 %vm823_vm0, %v2177_v31  ;;  %v725_v31 = vld [vmem:[#allocation10 + $0x70] sm:$0xff] }
 0x190   :  { %2062 = vmatprep.mubr.msk.bf16.mxu1 %vm2505_vm2, %v2504_v6  ;;  %v721_v6 = vld [vmem:[#allocation10 + $0x50] sm:$0xff] }
 0x197   :  { %2063 = vmatmul.mubr.bf16.vlgmr.msra.gmra.mrb[36].mxu1 %v2715_v32 }
 0x22a   :  { %v2016_v35 = vpop.f32.mrb[4].mxu1 }
 0x22b   :  { %v919_v37 = vadd.f32 %v2016_v35, %v713_v33  ;;  %v910_v38 = vpop.f32.mrb[5].mxu1  ;;  %v1864_v33 = vld [vmem:[#allocation7] sm:$0xff]  }
 0x22c   :  { %v911_v40 = vadd.f32 %v910_v38, %v711_v34  ;;  %v2017_v41 = vpop.f32.mrb[6].mxu1  ;;  %v723_v35 = vld [vmem:[#allocation10 + $0x60] sm:$0xff] }
 0x22d   :  { %v1805_v42 = vmul.f32 -1.442695, %v919_v37  ;;  %v922_v43 = vadd.f32 %v2017_v41, %v714_v36  ;;  %v913_v44 = vpop.f32.mrb[7].mxu1 }
 0x22e   :  { %v1803_v45 = vmul.f32 -1.442695, %v911_v40  ;;  %v914_v46 = vadd.f32 %v913_v44, %v712_v39  ;;  %v726_v39 = vld [vmem:[#allocation10 + $0x78] sm:$0xff]  ;;  %v1869_v40 = vunpack.c.l.bf16 %v1927_v29 }
 0x22f   :  { %2204 = vpow2.f32 %v1805_v42  ;;  %v1806_v47 = vmul.f32 -1.442695, %v922_v43 }
 0x230   :  { %2206 = vpow2.f32 %v1803_v45  ;;  %v1804_v48 = vmul.f32 -1.442695, %v914_v46  ;;  %v724_v45 = vld [vmem:[#allocation10 + $0x68] sm:$0xff]  ;;  %v1865_v46 = vunpack.c.l.bf16 %v1864_v33 }
 0x231   :  { %2208 = vpow2.f32 %v1806_v47 }
 0x232   :  { %2210 = vpow2.f32 %v1804_v48  ;;  %v2020_v51 = vpop.f32.mrb[8].mxu1 }
 0x233   :  { %v935_v54 = vadd.f32 %v2020_v51, %v717_v49  ;;  %v926_v56 = vpop.f32.mrb[9].mxu1  ;;  %v1870_v51 = vunpack.c.h.bf16 %v1927_v29 }
 0x234   :  { %v927_v60 = vadd.f32 %v926_v56, %v715_v50  ;;  %v2021_v61 = vpop.f32.mrb[10].mxu1 }
 0x235   :  { %v1809_v62 = vmul.f32 -1.442695, %v935_v54  ;;  %v938_v63 = vadd.f32 %v2021_v61, %v718_v53  ;;  %v929_v1 = vpop.f32.mrb[11].mxu1 }
 0x236   :  { %v1807_v2 = vmul.f32 -1.442695, %v927_v60  ;;  %v930_v3 = vadd.f32 %v929_v1, %v716_v58  ;;  %v2718_v60 = vld [vmem:[#allocation7 + $0x18] sm:$0xff]   ;;  %v1866_v1 = vunpack.c.h.bf16 %v1864_v33 }
 0x237   :  { %2212 = vpow2.f32 %v1809_v62  ;;  %v1810_v4 = vmul.f32 -1.442695, %v938_v63 }
 0x238   :  { %2214 = vpow2.f32 %v1807_v2  ;;  %v1808_v5 = vmul.f32 -1.442695, %v930_v3  ;;  %v2720_v2 = vld [vmem:[#allocation7 + $0x10] sm:$0xff]  }
 0x239   :  { %v2205_v7 = vpop.eup %2204  ;;  %2216 = vpow2.f32 %v1810_v4 }
 0x23a   :  { %v2207_v9 = vpop.eup %2206  ;;  %v1135_v10 = vadd.f32 1.0, %v2205_v7  ;;  %2218 = vpow2.f32 %v1808_v5  ;;  %v2024_v11 = vpop.f32.mrb[12].mxu1  ;;  %v729_v7 = vld [vmem:[#allocation10 + $0x90] sm:$0xff] }
 0x23b   :  { %v2209_v13 = vpop.eup %2208  ;;  %v1133_v14 = vadd.f32 1.0, %v2207_v9  ;;  %v951_v15 = vadd.f32 %v2024_v11, %v721_v6  ;;  %v942_v16 = vpop.f32.mrb[13].mxu1 }
 0x23c   :  { %v2211_v18 = vpop.eup %2210  ;;  %2220 = vrcp.f32 %v1135_v10  ;;  %v1136_v19 = vadd.f32 1.0, %v2209_v13  ;;  %v943_v20 = vadd.f32 %v942_v16, %v719_v8  ;;  %v2025_v21 = vpop.f32.mrb[14].mxu1  ;;  %v1877_v8 = vunpack.c.l.bf16 %v2718_v60  ;;  %v727_v10 = vld [vmem:[#allocation10 + $0x80] sm:$0xff]  ;;  %v730_v16 = vld [vmem:[#allocation10 + $0x98] sm:$0xff] }
 0x23d   :  { %2222 = vrcp.f32 %v1133_v14  ;;  %v1134_v22 = vadd.f32 1.0, %v2211_v18  ;;  %v1813_v23 = vmul.f32 -1.442695, %v951_v15  ;;  %v954_v24 = vadd.f32 %v2025_v21, %v722_v12  ;;  %v945_v25 = vpop.f32.mrb[15].mxu1 }
 0x23e   :  { %2224 = vrcp.f32 %v1136_v19  ;;  %v1811_v26 = vmul.f32 -1.442695, %v943_v20  ;;  %v946_v27 = vadd.f32 %v945_v25, %v720_v17  ;;  %v1873_v13 = vunpack.c.l.bf16 %v2720_v2 }
 0x23f   :  { %2226 = vrcp.f32 %v1134_v22  ;;  %v1814_v28 = vmul.f32 -1.442695, %v954_v24  ;;  %v1878_v19 = vunpack.c.h.bf16 %v2718_v60  ;;  %v728_v24 = vld [vmem:[#allocation10 + $0x88] sm:$0xff] }
 0x240   :  { %2228 = vpow2.f32 %v1813_v23  ;;  %v1812_v30 = vmul.f32 -1.442695, %v946_v27 }
 0x241   :  { %v2213_v34 = vpop.eup %2212  ;;  %2230 = vpow2.f32 %v1811_v26 }
 0x242   :  { %v2215_v36 = vpop.eup %2214  ;;  %v1139_v37 = vadd.f32 1.0, %v2213_v34  ;;  %2232 = vpow2.f32 %v1814_v28  ;;  %v2028_v38 = vpop.f32.mrb[16].mxu1 }
 0x243   :  { %v2217_v41 = vpop.eup %2216  ;;  %v1137_v42 = vadd.f32 1.0, %v2215_v36  ;;  %2234 = vpow2.f32 %v1812_v30  ;;  %v967_v43 = vadd.f32 %v2028_v38, %v725_v31  ;;  %v958_v44 = vpop.f32.mrb[17].mxu1  ;;  %v1874_v31 = vunpack.c.h.bf16 %v2720_v2 }
 0x244   :  { %v2219_v47 = vpop.eup %2218  ;;  %2236 = vrcp.f32 %v1139_v37  ;;  %v1140_v48 = vadd.f32 1.0, %v2217_v41  ;;  %v959_v49 = vadd.f32 %v958_v44, %v723_v35  ;;  %v2029_v50 = vpop.f32.mrb[18].mxu1 }
 0x245   :  { %2238 = vrcp.f32 %v1137_v42  ;;  %v1138_v53 = vadd.f32 1.0, %v2219_v47  ;;  %v1817_v54 = vmul.f32 -1.442695, %v967_v43  ;;  %v970_v56 = vadd.f32 %v2029_v50, %v726_v39  ;;  %v961_v58 = vpop.f32.mrb[19].mxu1  ;;  %v2738_v42 = vld [vmem:[#allocation7 + $0x28] sm:$0xff]   ;;  %v733_v47 = vld [vmem:[#allocation10 + $0xb0] sm:$0xff] }
 0x246   :  { %v2221_v61 = vpop.eup %2220  ;;  %2240 = vrcp.f32 %v1140_v48  ;;  %v1815_v62 = vmul.f32 -1.442695, %v959_v49  ;;  %v962_v63 = vadd.f32 %v961_v58, %v724_v45  ;;  %v731_v49 = vld [vmem:[#allocation10 + $0xa0] sm:$0xff]  ;;  %v734_v58 = vld [vmem:[#allocation10 + $0xb8] sm:$0xff] }
 0x247   :  { %v2223_v3 = vpop.eup %2222  ;;  %2242 = vrcp.f32 %v1138_v53  ;;  %v1818_v4 = vmul.f32 -1.442695, %v970_v56  ;;  %v2723_v11 = vmul.f32 %v2221_v61, %v1869_v40  ;;  %v1885_v53 = vunpack.c.l.bf16 %v2738_v42 }
 0x248   :  { %v2225_v5 = vpop.eup %2224  ;;  %2244 = vpow2.f32 %v1817_v54  ;;  %v1816_v6 = vmul.f32 -1.442695, %v962_v63  ;;  %v2728_v17 = vmul.f32 %v2223_v3, %v1865_v46 }
 0x249   :  { %v2227_v9 = vpop.eup %2226  ;;  %2246 = vpow2.f32 %v1815_v62  ;;  %v2725_v12 = vmul.f32 %v2225_v5, %v1870_v51  ;;  %v1886_v62 = vunpack.c.h.bf16 %v2738_v42 }
 0x24a   :  { %v2229_v14 = vpop.eup %2228  ;;  %2248 = vpow2.f32 %v1818_v4  ;;  %v2032_v15 = vpop.f32.mrb[20].mxu1  ;;  %v2730_v18 = vmul.f32 %v2227_v9, %v1866_v1  ;;  %v732_v4 = vld [vmem:[#allocation10 + $0xa8] sm:$0xff] }
 0x24b   :  { %v2231_v20 = vpop.eup %2230  ;;  %v1143_v21 = vadd.f32 1.0, %v2229_v14  ;;  %2250 = vpow2.f32 %v1816_v6  ;;  %v983_v22 = vadd.f32 %v2032_v15, %v729_v7  ;;  %v974_v23 = vpop.f32.mrb[21].mxu1  ;;  %v1327_v25 = vpack.c.bf16 %v2725_v12, %v2723_v11 }
 0x24c   :  { %v2233_v26 = vpop.eup %2232  ;;  %v1141_v27 = vadd.f32 1.0, %v2231_v20  ;;  %v975_v28 = vadd.f32 %v974_v23, %v727_v10  ;;  %v2033_v29 = vpop.f32.mrb[22].mxu1  ;;  %v1326_v30 = vpack.c.bf16 %v2730_v18, %v2728_v17 }
 0x24d   :  { %v2235_v33 = vpop.eup %2234  ;;  %2252 = vrcp.f32 %v1143_v21  ;;  %v1144_v34 = vadd.f32 1.0, %v2233_v26  ;;  %v1821_v35 = vmul.f32 -1.442695, %v983_v22  ;;  %v986_v36 = vadd.f32 %v2033_v29, %v730_v16  ;;  %v977_v37 = vpop.f32.mrb[23].mxu1  ;;  %v2754_v29 = vld [vmem:[#allocation7 + $0x38] sm:$0xff]  }
 0x24e   :  { %v2237_v38 = vpop.eup %2236  ;;  %2254 = vrcp.f32 %v1141_v27  ;;  %v1142_v39 = vadd.f32 1.0, %v2235_v33  ;;  %v1819_v40 = vmul.f32 -1.442695, %v975_v28  ;;  %v978_v41 = vadd.f32 %v977_v37, %v728_v24  ;;  %v735_v37 = vld [vmem:[#allocation10 + $0xc0] sm:$0xff] }
 0x24f   :  { %v2239_v43 = vpop.eup %2238  ;;  %2256 = vrcp.f32 %v1144_v34  ;;  %v1822_v44 = vmul.f32 -1.442695, %v986_v36  ;;  %v2740_v50 = vmul.f32 %v2237_v38, %v1877_v8  ;;  %v737_v34 = vld [vmem:[#allocation10 + $0xd0] sm:$0xff]  ;;  %v242_v36 = vsub.s32 2, %v2674_v55 }
 0x250   :  { %v2241_v45 = vpop.eup %2240  ;;  %2258 = vrcp.f32 %v1142_v39  ;;  %v1820_v46 = vmul.f32 -1.442695, %v978_v41  ;;  %v2745_v60 = vmul.f32 %v2239_v43, %v1873_v13  ;;  %v1930_v13 = vld [vmem:[#allocation7 + $0x20] sm:$0xff]   ;;  %v1893_v43 = vunpack.c.l.bf16 %v2754_v29 }
 0x251   :  { %v2243_v48 = vpop.eup %2242  ;;  %2260 = vpow2.f32 %v1821_v35  ;;  %v2742_v51 = vmul.f32 %v2241_v45, %v1878_v19  ;;  %v1881_v27 = vunpack.c.l.bf16 %v1930_v13  ;;  %v1882_v28 = vunpack.c.h.bf16 %v1930_v13 }
 0x252   :  { %v2245_v54 = vpop.eup %2244  ;;  %2262 = vpow2.f32 %v1819_v40  ;;  %v2036_v56 = vpop.f32.mrb[24].mxu1  ;;  %v2747_v61 = vmul.f32 %v2243_v48, %v1874_v31  ;;  %v738_v40 = vld [vmem:[#allocation10 + $0xd8] sm:$0xff] }
 0x253   :  { %v2247_v63 = vpop.eup %2246  ;;  %v1147_v1 = vadd.f32 1.0, %v2245_v54  ;;  %2264 = vpow2.f32 %v1822_v44  ;;  %v999_v2 = vadd.f32 %v2036_v56, %v733_v47  ;;  %v990_v3 = vpop.f32.mrb[25].mxu1  ;;  %v1329_v5 = vpack.c.bf16 %v2742_v51, %v2740_v50  ;;  %v736_v47 = vld [vmem:[#allocation10 + $0xc8] sm:$0xff] }
 0x254   :  { %v2249_v6 = vpop.eup %2248  ;;  %v1145_v7 = vadd.f32 1.0, %v2247_v63  ;;  %2266 = vpow2.f32 %v1820_v46  ;;  %v991_v8 = vadd.f32 %v990_v3, %v731_v49  ;;  %v2037_v9 = vpop.f32.mrb[26].mxu1  ;;  %v1328_v10 = vpack.c.bf16 %v2747_v61, %v2745_v60 }
 0x255   :  { %v2251_v14 = vpop.eup %2250  ;;  %2268 = vrcp.f32 %v1147_v1  ;;  %v1148_v15 = vadd.f32 1.0, %v2249_v6  ;;  %v1825_v16 = vmul.f32 -1.442695, %v999_v2  ;;  %v1002_v19 = vadd.f32 %v2037_v9, %v734_v58  ;;  %v993_v20 = vpop.f32.mrb[27].mxu1 }
 0x256   :  { %2270 = vrcp.f32 %v1145_v7  ;;  %v1146_v21 = vadd.f32 1.0, %v2251_v14  ;;  %v1823_v22 = vmul.f32 -1.442695, %v991_v8  ;;  %v994_v23 = vadd.f32 %v993_v20, %v732_v4  ;;  %v1932_v14 = vld [vmem:[#allocation7 + $0x30] sm:$0xff]   ;;  %v2771_v20 = vld [vmem:[#allocation7 + $0x48] sm:$0xff]  }
 0x257   :  { %v2253_v24 = vpop.eup %2252  ;;  %2272 = vrcp.f32 %v1148_v15  ;;  %v1826_v26 = vmul.f32 -1.442695, %v1002_v19  ;;  %v1894_v6 = vunpack.c.h.bf16 %v2754_v29  ;;  %v739_v29 = vld [vmem:[#allocation10 + $0xe0] sm:$0xff] }
 0x258   :  { %v2255_v31 = vpop.eup %2254  ;;  %2274 = vrcp.f32 %v1146_v21  ;;  %v1824_v33 = vmul.f32 -1.442695, %v994_v23  ;;  %v2757_v41 = vmul.f32 %v2253_v24, %v1885_v53  ;;  %v1890_v21 = vunpack.c.h.bf16 %v1932_v14  ;;  %v741_v24 = vld [vmem:[#allocation10 + $0xf0] sm:$0xff] }
 0x259   :  { %v2257_v35 = vpop.eup %2256  ;;  %2276 = vpow2.f32 %v1825_v16  ;;  %v2762_v48 = vmul.f32 %v2255_v31, %v1881_v27  ;;  %v243_v27 = vrot.slane %v2680_v57, %v242_v36  ;;  %v1889_v31 = vunpack.c.l.bf16 %v1932_v14 }
 0x25a   :  { %v2259_v38 = vpop.eup %2258  ;;  %2278 = vpow2.f32 %v1823_v22  ;;  %v2040_v39 = vpop.f32.mrb[28].mxu1  ;;  %v2759_v42 = vmul.f32 %v2257_v35, %v1886_v62  ;;  %v742_v35 = vld [vmem:[#allocation10 + $0xf8] sm:$0xff]  ;;  %v1902_v57 = vunpack.c.h.bf16 %v2771_v20 }
 0x25b   :  { %v2261_v44 = vpop.eup %2260  ;;  %2280 = vpow2.f32 %v1826_v26  ;;  %v1015_v45 = vadd.f32 %v2040_v39, %v737_v34  ;;  %v1006_v46 = vpop.f32.mrb[29].mxu1  ;;  %v2764_v49 = vmul.f32 %v2259_v38, %v1882_v28 }
 0x25c   :  { %v2263_v54 = vpop.eup %2262  ;;  %v1151_v56 = vadd.f32 1.0, %v2261_v44  ;;  %2282 = vpow2.f32 %v1824_v33  ;;  %v1007_v58 = vadd.f32 %v1006_v46, %v735_v37  ;;  %v2041_v63 = vpop.f32.mrb[30].mxu1  ;;  %v1331_v53 = vpack.c.bf16 %v2759_v42, %v2757_v41  ;;  %v740_v46 = vld [vmem:[#allocation10 + $0xe8] sm:$0xff]  ;;  %v2183_v41 = vld [vmem:[#allocation13 + $0x18] ss:$12 sps:$4 sm:$0xff]  }
 0x25d   :  { %v2265_v62 = vpop.eup %2264  ;;  %v1149_v1 = vadd.f32 1.0, %v2263_v54  ;;  %v1018_v2 = vadd.f32 %v2041_v63, %v738_v40  ;;  %v1009_v3 = vpop.f32.mrb[31].mxu1  ;;  %v1330_v4 = vpack.c.bf16 %v2764_v49, %v2762_v48  ;;  %v1829_v9 = vmul.f32 -1.442695, %v1015_v45  ;;  %v2182_v48 = vld [vmem:[#allocation13 + $0x4] ss:$12 sps:$4 sm:$0xff]  }
 0x25e   :  { %v2267_v7 = vpop.eup %2266  ;;  %2284 = vrcp.f32 %v1151_v56  ;;  %v1152_v8 = vadd.f32 1.0, %v2265_v62  ;;  %v1010_v13 = vadd.f32 %v1009_v3, %v736_v47  ;;  %v1827_v19 = vmul.f32 -1.442695, %v1007_v58  ;;  %v1934_v3 = vld [vmem:[#allocation7 + $0x40] sm:$0xff]  }
 0x25f   :  { %v2269_v15 = vpop.eup %2268  ;;  %2286 = vrcp.f32 %v1149_v1  ;;  %v1150_v16 = vadd.f32 1.0, %v2267_v7  ;;  %v1830_v23 = vmul.f32 -1.442695, %v1018_v2  ;;  %v1901_v37 = vunpack.c.l.bf16 %v2771_v20  ;;  %v2180_v49 = vld [vmem:[#allocation13] ss:$12 sps:$4 sm:$0xff]  }
 0x260   :  { %v2271_v22 = vpop.eup %2270  ;;  %2288 = vrcp.f32 %v1152_v8  ;;  %v1828_v28 = vmul.f32 -1.442695, %v1010_v13  ;;  %v2775_v38 = vmul.f32 %v2269_v15, %v1893_v43  ;;  %v2188_v42 = vld [vmem:[#allocation13 + $0x34] ss:$12 sps:$4 sm:$0xff]  }
 0x261   :  { %v2273_v26 = vpop.eup %2272  ;;  %2290 = vrcp.f32 %v1150_v16 }
 0x262   :  { %v2275_v33 = vpop.eup %2274  ;;  %2292 = vpow2.f32 %v1829_v9  ;;  %v2044_v34 = vpop.f32.mrb[32].mxu1  ;;  %v2777_v39 = vmul.f32 %v2273_v26, %v1894_v6  ;;  %v2784_v6 = vmul.f32 %v2271_v22, %v1889_v31  ;;  %v488_v22 = vadd.f32 %v2683_v59, %v243_v27 }
 0x263   :  { %v2277_v40 = vpop.eup %2276  ;;  %2294 = vpow2.f32 %v1827_v19  ;;  %v1031_v44 = vadd.f32 %v2044_v34, %v741_v24  ;;  %v1022_v45 = vpop.f32.mrb[33].mxu1  ;;  %v2780_v36 = vmul.f32 %v2275_v33, %v1890_v21  ;;  %v1897_v21 = vunpack.c.l.bf16 %v1934_v3 }
 0x264   :  { %v2279_v47 = vpop.eup %2278  ;;  %v1155_v54 = vadd.f32 1.0, %v2277_v40  ;;  %2296 = vpow2.f32 %v1830_v23  ;;  %v1023_v56 = vadd.f32 %v1022_v45, %v739_v29  ;;  %v2045_v58 = vpop.f32.mrb[34].mxu1  ;;  %v1333_v43 = vpack.c.bf16 %v2777_v39, %v2775_v38  ;;  %v2194_v38 = vld [vmem:[#allocation13 + $0x64] ss:$12 sps:$4 sm:$0xff]   ;;  %v2192_v39 = vld [vmem:[#allocation13 + $0x60] ss:$12 sps:$4 sm:$0xff]  }
 0x265   :  { %v2281_v63 = vpop.eup %2280  ;;  %v1153_v62 = vadd.f32 1.0, %v2279_v47  ;;  %2298 = vpow2.f32 %v1828_v28  ;;  %v1034_v1 = vadd.f32 %v2045_v58, %v742_v35  ;;  %v1025_v2 = vpop.f32.mrb[35].mxu1  ;;  %v1833_v9 = vmul.f32 -1.442695, %v1031_v44  ;;  %v1937_v47 = vld [vmem:[#allocation7 + $0x58] sm:$0xff]   ;;  %v1936_v58 = vld [vmem:[#allocation7 + $0x50] sm:$0xff]  }
 0x266   :  { %v2283_v7 = vpop.eup %2282  ;;  %2300 = vrcp.f32 %v1155_v54  ;;  %v1156_v8 = vadd.f32 1.0, %v2281_v63  ;;  %v1026_v13 = vadd.f32 %v1025_v2, %v740_v46  ;;  %v1831_v15 = vmul.f32 -1.442695, %v1023_v56 }
 0x267   :  { %2302 = vrcp.f32 %v1153_v62  ;;  %v1154_v14 = vadd.f32 1.0, %v2283_v7  ;;  %v1332_v16 = vpack.c.bf16 %v2780_v36, %v2784_v6  ;;  %v1834_v20 = vmul.f32 -1.442695, %v1034_v1  ;;  %v2191_v36 = vld [vmem:[#allocation13 + $0x4c] ss:$12 sps:$4 sm:$0xff]  }
 0x268   :  { %v2285_v19 = vpop.eup %2284  ;;  %2304 = vrcp.f32 %v1156_v8  ;;  %v1898_v23 = vunpack.c.h.bf16 %v1934_v3  ;;  %v1832_v26 = vmul.f32 -1.442695, %v1026_v13  ;;  %v1910_v7 = vunpack.c.h.bf16 %v1937_v47  ;;  %v2189_v6 = vld [vmem:[#allocation13 + $0x48] ss:$12 sps:$4 sm:$0xff]  }
 0x269   :  { %v2287_v24 = vpop.eup %2286  ;;  %2306 = vrcp.f32 %v1154_v14  ;;  %v1311_v34 = vmul.f32 %v2285_v19, %v1901_v37  ;;  %v1905_v13 = vunpack.c.l.bf16 %v1936_v58  ;;  %v1906_v14 = vunpack.c.h.bf16 %v1936_v58 }
 0x26a   :  { %v2289_v28 = vpop.eup %2288  ;;  %2308 = vpow2.f32 %v1833_v9  ;;  %v1624_v29 = vpop.f32.mrb[36].mxu1  ;;  %v1309_v45 = vmul.f32 %v2287_v24, %v1897_v21 }
 0x26b   :  { %v2291_v31 = vpop.eup %2290  ;;  %2310 = vpow2.f32 %v1831_v15  ;;  %v2789_v33 = vadd.f32 %v1624_v29, %v488_v22  ;;  %v1312_v35 = vmul.f32 %v2289_v28, %v1902_v57  ;;  %v2064_v40 = vpop.f32.mrb[37].mxu1  ;;  %v1909_v57 = vunpack.c.l.bf16 %v1937_v47 }
 0x26c   :  { %v2293_v44 = vpop.eup %2292  ;;  %2312 = vpow2.f32 %v1834_v20  ;;  %v1310_v46 = vmul.f32 %v2291_v31, %v1898_v23  ;;  %v1627_v54 = vpop.f32.mrb[38].mxu1 }
 0x26d   :  { %v2295_v56 = vpop.eup %2294  ;;  %v1159_v59 = vadd.f32 1.0, %v2293_v44  ;;  %2314 = vpow2.f32 %v1832_v26  ;;  %v1335_v27 = vpack.c.bf16 %v1312_v35, %v1311_v34  ;;  %v2065_v63 = vpop.f32.mrb[39].mxu1  ;;  %v1939_v34 = vld [vmem:[#allocation7 + $0x68] sm:$0xff]  }
 0x26e   :  { %v2297_v62 = vpop.eup %2296  ;;  %v1157_v1 = vadd.f32 1.0, %v2295_v56  ;;  %v1334_v2 = vpack.c.bf16 %v1310_v46, %v1309_v45  ;;  %v1917_v46 = vunpack.c.l.bf16 %v1939_v34  ;;  %v1918_v47 = vunpack.c.h.bf16 %v1939_v34 }
 0x26f   :  { %v2299_v3 = vpop.eup %2298  ;;  %2316 = vrcp.f32 %v1159_v59  ;;  %v1160_v37 = vadd.f32 1.0, %v2297_v62 }
 0x270   :  { %v2301_v8 = vpop.eup %2300  ;;  %2318 = vrcp.f32 %v1157_v1  ;;  %v1158_v9 = vadd.f32 1.0, %v2299_v3  ;;  %1981 = vmatprep.subr.bf16.mxu0 %v1334_v2  ;;  %v1941_v1 = vld [vmem:[#allocation7 + $0x78] sm:$0xff]   ;;  %v1940_v3 = vld [vmem:[#allocation7 + $0x70] sm:$0xff]  }
 0x271   :  { %v2303_v15 = vpop.eup %2302  ;;  %2320 = vrcp.f32 %v1160_v37  ;;  %1982 = vmatpush3.bf16.msra.mxu0 %v1326_v30  ;;  %v1315_v21 = vmul.f32 %v2301_v8, %v1909_v57  ;;  %v1938_v30 = vld [vmem:[#allocation7 + $0x60] sm:$0xff]   ;;  %v1925_v61 = vunpack.c.l.bf16 %v1941_v1  ;;  %v1921_v57 = vunpack.c.l.bf16 %v1940_v3 }
 0x272   :  { %v2305_v19 = vpop.eup %2304  ;;  %2322 = vrcp.f32 %v1158_v9  ;;  %1983 = vmatprep.subr.bf16.mxu0 %v1335_v27  ;;  %v1313_v22 = vmul.f32 %v2303_v15, %v1905_v13  ;;  %v1913_v11 = vunpack.c.l.bf16 %v1938_v30  ;;  %v1914_v12 = vunpack.c.h.bf16 %v1938_v30 }
 0x273   :  { %v2307_v20 = vpop.eup %2306  ;;  %v1316_v23 = vmul.f32 %v2305_v19, %v1910_v7  ;;  %v1922_v7 = vunpack.c.h.bf16 %v1940_v3 }
 0x274   :  { %v2309_v24 = vpop.eup %2308  ;;  %v1314_v26 = vmul.f32 %v2307_v20, %v1906_v14  ;;  %v2203_v20 = vld [vmem:[#allocation13 + $0xac] ss:$12 sps:$4 sm:$0xff]  }
 0x275   :  { %v2311_v28 = vpop.eup %2310  ;;  %v1163_v29 = vadd.f32 1.0, %v2309_v24  ;;  %1984 = vmatpush3.bf16.msra.mxu0 %v1327_v25  ;;  %v1337_v31 = vpack.c.bf16 %v1316_v23, %v1315_v21  ;;  %v2201_v21 = vld [vmem:[#allocation13 + $0xa8] ss:$12 sps:$4 sm:$0xff]  }
 0x276   :  { %v2313_v35 = vpop.eup %2312  ;;  %v1161_v17 = vadd.f32 1.0, %v2311_v28  ;;  %v1336_v18 = vpack.c.bf16 %v1314_v26, %v1313_v22 }
 0x277   :  { %v2315_v40 = vpop.eup %2314  ;;  %2324 = vrcp.f32 %v1163_v29  ;;  %v1164_v44 = vadd.f32 1.0, %v2313_v35  ;;  %v234_v29 = vsub.s32 0, %v2674_v55  ;;  %v238_v35 = vsub.s32 1, %v2674_v55 }
 0x278   :  { %2326 = vrcp.f32 %v1161_v17  ;;  %v1162_v45 = vadd.f32 1.0, %v2315_v40  ;;  %1985 = vmatprep.subr.bf16.mxu0 %v1336_v18 }
 0x279   :  { %v2317_v54 = vpop.eup %2316  ;;  %2328 = vrcp.f32 %v1164_v44  ;;  %1986 = vmatpush3.bf16.msra.mxu0 %v1328_v10  ;;  %v1926_v10 = vunpack.c.h.bf16 %v1941_v1 }
 0x27a   :  { %v2319_v25 = vpop.eup %2318  ;;  %2330 = vrcp.f32 %v1162_v45  ;;  %1987 = vmatprep.subr.bf16.mxu0 %v1337_v31  ;;  %v1319_v27 = vmul.f32 %v2317_v54, %v1917_v46  ;;  %v2344_v31 = vld [vmem:[%s2857_s9] sm:$0xf]  ;;  %s2506_s9 = smov [#allocation15]  }
 0x27b   :  { %v2321_v56 = vpop.eup %2320  ;;  %v1317_v63 = vmul.f32 %v2319_v25, %v1913_v11  ;;  %v235_v34 = vrot.slane %v2344_v31, %v234_v29  ;;  %s1664_s7 = sshll.u32 %s2506_s9, 4  ;;  %s1665_s7 = int_to_ptr.vmem [resolvable:$true] %s1664_s7 }
 0x27c   :  { %v2323_v59 = vpop.eup %2322  ;;  %v1320_v58 = vmul.f32 %v2321_v56, %v1918_v47  ;;  %s2437_s13 = scalar_lea.vmem %s1665_s7, 64  ;;  %p2442_p1 = scmp.lt.s32.totalorder %s1665_s7, %s1665_s7 }
 0x27d   :  { %1988 = vmatpush3.bf16.msra.mxu0 %v1329_v5  ;;  %v1318_v62 = vmul.f32 %v2323_v59, %v1914_v12  ;;  %p2438_p0 = scmp.ne.s32.totalorder %s1665_s7, %s2437_s13  ;;  %p2443_p2 = scmp.lt.s32.totalorder %s2437_s13, %s2437_s13 }
 0x27e   :  { %v1339_v2 = vpack.c.bf16 %v1320_v58, %v1319_v27 }
 0x27f   :  { %v1338_v60 = vpack.c.bf16 %v1318_v62, %v1317_v63  ;;  %p2444_p3 = por %p2443_p2, %p2442_p1 }
 0x281   :  { %v2325_v37 = vpop.eup %2324  ;;  %1989 = vmatprep.subr.bf16.mxu0 %v1338_v60  ;;  %p2445_p4 = pnand %p2444_p3, %p2438_p0 }
 0x282   :  { %v2327_v8 = vpop.eup %2326  ;;  %1990 = vmatpush3.bf16.msra.mxu0 %v1330_v4  ;;  %v1323_v51 = vmul.f32 %v2325_v37, %v1925_v61  ;;  %v2185_v4 = vld [vmem:[#allocation13 + $0x1c] ss:$12 sps:$4 sm:$0xff]  }
 0x283   :  { %v2329_v9 = vpop.eup %2328  ;;  %1991 = vmatprep.subr.bf16.mxu0 %v1339_v2  ;;  %v1321_v13 = vmul.f32 %v2327_v8, %v1921_v57 }
 0x284   :  { %v2331_v50 = vpop.eup %2330  ;;  %v1324_v5 = vmul.f32 %v2329_v9, %v1926_v10 }
 0x285   :  { %v1322_v14 = vmul.f32 %v2331_v50, %v1922_v7 }
 0x286   :  { %1992 = vmatpush3.bf16.msra.mxu0 %v1331_v53  ;;  %v1341_v15 = vpack.c.bf16 %v1324_v5, %v1323_v51  ;;  %v2186_v53 = vld [vmem:[#allocation13 + $0x30] ss:$12 sps:$4 sm:$0xff]  }
 0x287   :  { %v1340_v19 = vpack.c.bf16 %v1322_v14, %v1321_v13 }
 0x289   :  { %1993 = vmatprep.subr.bf16.mxu0 %v1340_v19 }
 0x28a   :  { %1994 = vmatpush3.bf16.msra.mxu0 %v1332_v16  ;;  %v2200_v16 = vld [vmem:[#allocation13 + $0x94] ss:$12 sps:$4 sm:$0xff]  }
 0x28b   :  { %1995 = vmatprep.subr.bf16.mxu0 %v1341_v15 }
 0x28e   :  { %1996 = vmatpush3.bf16.msra.mxu0 %v1333_v43  ;;  %v2197_v43 = vld [vmem:[#allocation13 + $0x7c] ss:$12 sps:$4 sm:$0xff]  }
 0x28f   :  { %1549 = vmatprep.subr.bf16.mxu0 %v2182_v48 }
 0x291   :  { %1375 = vmatmul.mubr.bf16.vlgmr.msra.gmra.mrb[8].mxu0 %v2669_v52  ;;  %v2195_v52 = vld [vmem:[#allocation13 + $0x78] ss:$12 sps:$4 sm:$0xff]  }
 0x292   :  { %1550 = vmatpush1.bf16.msra.mxu0 %v2180_v49  ;;  %1581 = vmatprep.mubr.bf16.mxu0 %v2503_v0  ;;  %v2198_v0 = vld [vmem:[#allocation13 + $0x90] ss:$12 sps:$4 sm:$0xff]  }
 0x293   :  { %1551 = vmatprep.subr.bf16.mxu0 %v2185_v4 }
 0x296   :  { %1552 = vmatpush1.bf16.msra.mxu0 %v2183_v41 }
 0x297   :  { %1553 = vmatprep.subr.bf16.mxu0 %v2188_v42 }
 0x29a   :  { %1554 = vmatpush1.bf16.msra.mxu0 %v2186_v53 }
 0x29b   :  { %1555 = vmatprep.subr.bf16.mxu0 %v2191_v36 }
 0x29e   :  { %1556 = vmatpush1.bf16.msra.mxu0 %v2189_v6 }
 0x29f   :  { %1557 = vmatprep.subr.bf16.mxu0 %v2194_v38 }
 0x2a2   :  { %1558 = vmatpush1.bf16.msra.mxu0 %v2192_v39 }
 0x2a3   :  { %1559 = vmatprep.subr.bf16.mxu0 %v2197_v43 }
 0x2a6   :  { %1560 = vmatpush1.bf16.msra.mxu0 %v2195_v52 }
 0x2a7   :  { %1561 = vmatprep.subr.bf16.mxu0 %v2200_v16 }
 0x2aa   :  { %1562 = vmatpush1.bf16.msra.mxu0 %v2198_v0 }
 0x2ab   :  { %1563 = vmatprep.subr.bf16.mxu0 %v2203_v20 }
 0x2ae   :  { %1564 = vmatpush1.bf16.msra.mxu0 %v2201_v21 }
 0x2b1   :  { %1582 = vmatmul.mubr.bf16.vlgmr.msra.gmra.mrb[0].mxu0 %v2715_v32  ;;  %v239_v32 = vrot.slane %v2344_v31, %v238_v35 }
 0x364   :  { %v1997_v23 = vpop.f32.mrb[8].mxu0 }
 0x365   :  { %v1998_v24 = vpop.f32.mrb[9].mxu0 }
 0x366   :  { %v1999_v22 = vadd.f32 %v1998_v24, %v1997_v23  ;;  %v2000_v26 = vpop.f32.mrb[10].mxu0 }
 0x367   :  { %v2001_v28 = vpop.f32.mrb[11].mxu0 }
 0x384   :  { %v1583_v17 = vpop.f32.mrb[0].mxu0 }
 0x385   :  { %v2066_v18 = vadd.f32 %v1583_v17, %v235_v34  ;;  %v1585_v30 = vpop.f32.mrb[1].mxu0 }
 0x386   :  { %v1587_v40 = vpop.f32.mrb[2].mxu0  ;;  %v2067_v46 = vadd.f32 %v1585_v30, %v239_v32 }
 0x387   :  { %v1859_v44 = vmul.f32 -1.442695, %v2066_v18  ;;  %v1588_v45 = vpop.f32.mrb[3].mxu0 }
 0x388   :  { %v1860_v47 = vmul.f32 -1.442695, %v2067_v46 }
 0x389   :  { %2332 = vpow2.f32 %v1859_v44 }
 0x38a   :  { %2334 = vpow2.f32 %v1860_v47 }
 0x38b   :  { %2336 = vtanh.f32 %v2789_v33 }
 0x393   :  { %v2333_v54 = vpop.eup %2332 }
 0x394   :  { %v1639_v11 = vadd.f32 1.0, %v2333_v54  ;;  %v2335_v12 = vpop.eup %2334 }
 0x395   :  { %v2337_v25 = vpop.eup %2336  ;;  %v1649_v55 = vadd.f32 1.0, %v2335_v12 }
 0x396   :  { %2338 = vrcp.f32 %v1639_v11 }
 0x397   :  { %2340 = vrcp.f32 %v1649_v55 }
 0x3a0   :  { %v2339_v56 = vpop.eup %2338 }
 0x3a1   :  { %v1643_v59 = vmul.f32 %v2339_v56, %v2337_v25 }
 0x3a3   :  { %v1645_v27 = vadd.f32 %v1999_v22, %v1643_v59 }
 0x3a5   :  { %2342 = vtanh.f32 %v1645_v27  ;;  %v1654_v58 = vpack.c.bf16 %v1645_v27, %v1645_v27 }
 0x3a7   :  { %1655 = vst [vmem:[#allocation15] sm:$0xf] %v1654_v58 }
 0x3a8   :  { %2448 = shalt.err (!%p2445_p4)
}
 0x3a9   :  { %s2449_s8 = scalar_lea.hbm %s2858_s10, 64 }
 0x3aa   :  { %p2450_p5 = scmp.ne.s32.totalorder %s2858_s10, %s2449_s8  ;;  %p2453_p6 = scmp.lt.u32.totalorder %s2449_s8, %s2858_s10 }
 0x3ac   :  { %p2455_p7 = pnand %p2453_p6, %p2450_p5 }
 0x3ae   :  { %2458 = shalt.err (!%p2455_p7)
}
 0x3af   :  { %1667 = dma.vmem_to_hbm [thread:$0]  %s1665_s7, 64, %s2858_s10, [#allocation9]   ;;  %v2341_v33 = vpop.eup %2340 }
 0x3b0   :  { %v2343_v63 = vpop.eup %2342  ;;  %s2507_s23 = smov [#allocation16]  }
 0x3b1   :  { %s1674_s25 = sshll.u32 %s2507_s23, 4  ;;  %v1653_v62 = vmul.f32 %v2343_v63, %v2341_v33  ;;  %s1675_s25 = int_to_ptr.vmem [resolvable:$true] %s1674_s25 }
 0x3b2   :  { %s2459_s26 = scalar_lea.vmem %s1675_s25, 64  ;;  %p2464_p9 = scmp.lt.s32.totalorder %s1675_s25, %s1675_s25 }
 0x3b3   :  { %v1656_v1 = vpack.c.bf16 %v1653_v62, %v1653_v62  ;;  %p2460_p8 = scmp.ne.s32.totalorder %s1675_s25, %s2459_s26  ;;  %p2465_p10 = scmp.lt.s32.totalorder %s2459_s26, %s2459_s26 }
 0x3b5   :  { %1657 = vst [vmem:[#allocation16] sm:$0xf] %v1656_v1  ;;  %p2466_p11 = por %p2465_p10, %p2464_p9 }
 0x3b7   :  { %p2467_p12 = pnand %p2466_p11, %p2460_p8 }
 0x3b9   :  { %2470 = shalt.err (!%p2467_p12)
}
 0x3ba   :  { %s2471_s4 = scalar_lea.hbm %s2859_s11, 64 }
 0x3bb   :  { %p2472_p13 = scmp.ne.s32.totalorder %s2859_s11, %s2471_s4  ;;  %p2475_p0 = scmp.lt.u32.totalorder %s2471_s4, %s2859_s11 }
 0x3bd   :  { %p2477_p1 = pnand %p2475_p0, %p2472_p13 }
 0x3bf   :  { %2480 = shalt.err (!%p2477_p1)
}
 0x3c0   :  { %1677 = dma.vmem_to_hbm [thread:$0]  %s1675_s25, 64, %s2859_s11, [#allocation17]  }
 0x3c1   :  { %2487 = dma.done.wait [#allocation9], 64  }
 0x3c2   :  { %2488 = vsyncadd [#allocation9], 4294967232 }
 0x3c3   :  { %2489 = dma.done.wait [#allocation17], 64  }
 0x3c4   :  { %2490 = vsyncadd [#allocation17], 4294967232 }
 0x3c5   :  { %1684 = vsyncpa [#allocation8], 1 }
 0x3c6   :  { %1685 = vsyncpa [#allocation11], 1 }
 0x3c7   :  { %1686 = vsyncpa [#allocation14], 1 }
 0x3c8   :  { %1687 = vsyncpa [#allocation9], 1 }
 0x3c9   :  { %1688 = vsyncpa [#allocation17], 1 }

</bundles_post_ra>
